<compile_context>
chip_gen: v7x
topology: tpu7x:2x2x1
jax: 0.10.0
libtpu: 0.0.40
codegen_flags: <defaults>
</compile_context>

<pallas_src>
import jax
import jax.numpy as jnp
from jax.experimental import pallas as pl
from jax.experimental.pallas import tpu as pltpu


# -----------------------------------------------------------------------------
# Pallas kernels (everything is a (M, C) channels-last slab; lanes = channels)
# -----------------------------------------------------------------------------
def _mm_bias_relu_kernel(x_ref, w_ref, b_ref, o_ref):
    # o = relu(x @ w + b)    -- conv1 of BOTH temporal streams in one matmul
    acc = jnp.dot(x_ref[...], w_ref[...], preferred_element_type=jnp.float32)
    o_ref[...] = jnp.maximum(acc + b_ref[...], 0.0).astype(o_ref.dtype)


def _conv2_coarse_fuse_kernel(x_ref, w2_ref, b2_ref, wc_ref, bc_ref, o_ref):
    # Chained in VMEM:  f2 = relu(col2 @ W2 + b2)   (both streams, stride-2 conv)
    #                   o  = relu(f2 @ Wc + bc)     (coarse-scale MTF fuse)
    # f2 never leaves VMEM / registers.
    f2 = jnp.maximum(
        jnp.dot(x_ref[...], w2_ref[...], preferred_element_type=jnp.float32)
        + b2_ref[...], 0.0)
    acc = jnp.dot(f2.astype(wc_ref.dtype), wc_ref[...],
                  preferred_element_type=jnp.float32)
    o_ref[...] = jnp.maximum(acc + bc_ref[...], 0.0).astype(o_ref.dtype)


def _fine_fuse_add_kernel(x_ref, w_ref, b_ref, skip_ref, o_ref):
    # o = relu(f1_both @ Wf + bf) + upsampled_coarse   (MTF fine fuse + MSF add)
    acc = jnp.dot(x_ref[...], w_ref[...], preferred_element_type=jnp.float32)
    fused = jnp.maximum(acc + b_ref[...], 0.0)
    o_ref[...] = (fused + skip_ref[...].astype(jnp.float32)).astype(o_ref.dtype)


# -----------------------------------------------------------------------------
# pallas_call wrappers
# -----------------------------------------------------------------------------
def _row_grid(m, tm):
    tm = min(tm, m)
    return pl.cdiv(m, tm), tm


def matmul_bias_relu(x, w, b, *, out_dtype=jnp.bfloat16, tm=256):
    M, K = x.shape
    N = w.shape[1]
    grid_m, tm = _row_grid(M, tm)
    return pl.pallas_call(
        _mm_bias_relu_kernel,
        out_shape=jax.ShapeDtypeStruct((M, N), out_dtype),
        grid_spec=pltpu.PrefetchScalarGridSpec(
            num_scalar_prefetch=0,
            grid=(grid_m,),
            in_specs=[
                pl.BlockSpec((tm, K), lambda i: (i, 0)),
                pl.BlockSpec((K, N), lambda i: (0, 0)),
                pl.BlockSpec((1, N), lambda i: (0, 0)),
            ],
            out_specs=pl.BlockSpec((tm, N), lambda i: (i, 0)),
        ),
        compiler_params=pltpu.CompilerParams(
            dimension_semantics=("parallel",)),
    )(x, w, b.reshape(1, -1))


def conv2_coarse_fuse(col2, w2, b2, wc, bc, *, out_dtype=jnp.bfloat16):
    M, K = col2.shape
    N2 = w2.shape[1]
    Nc = wc.shape[1]
    return pl.pallas_call(
        _conv2_coarse_fuse_kernel,
        out_shape=jax.ShapeDtypeStruct((M, Nc), out_dtype),
        grid_spec=pltpu.PrefetchScalarGridSpec(
            num_scalar_prefetch=0,
            grid=(1,),
            in_specs=[
                pl.BlockSpec((M, K), lambda i: (0, 0)),
                pl.BlockSpec((K, N2), lambda i: (0, 0)),
                pl.BlockSpec((1, N2), lambda i: (0, 0)),
                pl.BlockSpec((N2, Nc), lambda i: (0, 0)),
                pl.BlockSpec((1, Nc), lambda i: (0, 0)),
            ],
            out_specs=pl.BlockSpec((M, Nc), lambda i: (0, 0)),
        ),
        compiler_params=pltpu.CompilerParams(
            dimension_semantics=("arbitrary",)),
    )(col2, w2, b2.reshape(1, -1), wc, bc.reshape(1, -1))


def fine_fuse_add(x, w, b, skip, *, out_dtype=jnp.float32, tm=256):
    M, K = x.shape
    N = w.shape[1]
    grid_m, tm = _row_grid(M, tm)
    return pl.pallas_call(
        _fine_fuse_add_kernel,
        out_shape=jax.ShapeDtypeStruct((M, N), out_dtype),
        grid_spec=pltpu.PrefetchScalarGridSpec(
            num_scalar_prefetch=0,
            grid=(grid_m,),
            in_specs=[
                pl.BlockSpec((tm, K), lambda i: (i, 0)),
                pl.BlockSpec((K, N), lambda i: (0, 0)),
                pl.BlockSpec((1, N), lambda i: (0, 0)),
                pl.BlockSpec((tm, N), lambda i: (i, 0)),
            ],
            out_specs=pl.BlockSpec((tm, N), lambda i: (i, 0)),
        ),
        compiler_params=pltpu.CompilerParams(
            dimension_semantics=("parallel",)),
    )(x, w, b.reshape(1, -1), skip)


# -----------------------------------------------------------------------------
# Wrapper-side glue (cheap XLA ops on tiny arrays)
# -----------------------------------------------------------------------------
def _im2col(x_nhwc, ksize, stride, pad):
    # Patch features ordered (dy, dx, cin) — matches the packed weight layout.
    N, H, W, C = x_nhwc.shape
    xp = jnp.pad(x_nhwc, ((0, 0), (pad, pad), (pad, pad), (0, 0)))
    Ho = (H + 2 * pad - ksize) // stride + 1
    Wo = (W + 2 * pad - ksize) // stride + 1
    patches = []
    for dy in range(ksize):
        for dx in range(ksize):
            patches.append(
                xp[:, dy:dy + stride * Ho:stride, dx:dx + stride * Wo:stride, :])
    col = jnp.concatenate(patches, axis=-1)
    return col.reshape(N * Ho * Wo, ksize * ksize * C), (N, Ho, Wo)


def backbone_mtf_msf_forward(img_nchw, pp):
    """img_nchw: (N, 6, H, W); pp: packed params from pack_params()."""
    N, _, H, W = img_nchw.shape
    # torch.split(img, 3, 1)  + NCHW -> NHWC, cast to bf16 for the MXU path
    img_t0 = jnp.transpose(img_nchw[:, :3], (0, 2, 3, 1)).astype(jnp.bfloat16)
    img_t1 = jnp.transpose(img_nchw[:, 3:6], (0, 2, 3, 1)).astype(jnp.bfloat16)

    # --- conv1 of BOTH temporal streams: one pallas_call, one matmul --------
    col_t0, _ = _im2col(img_t0, 3, 1, 1)                     # (N*H*W, 27)
    col_t1, _ = _im2col(img_t1, 3, 1, 1)                     # (N*H*W, 27)
    col1 = jnp.concatenate([col_t0, col_t1], axis=-1)        # (N*H*W, 54)
    f1_both = matmul_bias_relu(col1, pp['w1'], pp['b1'])     # (N*H*W, 2*c1) bf16
    c1x2 = pp['w1'].shape[1]

    # --- conv2 (stride 2, both streams) + coarse MTF fuse: one pallas_call --
    f1_nhwc = f1_both.reshape(N, H, W, c1x2)
    col2, (_, Ho, Wo) = _im2col(f1_nhwc, 3, 2, 1)            # (N*Ho*Wo, 9*2*c1)
    coarse = conv2_coarse_fuse(col2, pp['w2'], pp['b2'],
                               pp['wc'], pp['bc'])           # (N*Ho*Wo, cf) bf16
    cf = pp['wc'].shape[1]

    # --- MSF: 2x nearest upsample of the (tiny) coarse fused map ------------
    coarse_up = jnp.repeat(
        jnp.repeat(coarse.reshape(N, Ho, Wo, cf), 2, axis=1),
        2, axis=2).reshape(N * H * W, cf)

    # --- fine MTF fuse + MSF add: one pallas_call ----------------------------
    out = fine_fuse_add(f1_both, pp['wf'], pp['bf'], coarse_up)   # (N*H*W, cf) f32
    out_nhwc = out.reshape(N, H, W, cf)
    return {'out': jnp.transpose(out_nhwc, (0, 3, 1, 2))}         # NCHW


# -----------------------------------------------------------------------------
# Deterministic parameter init + packing into combined (block-diagonal) weights
# -----------------------------------------------------------------------------
def init_params(key, c_in=3, c1=16, c2=32, cf=16):
    keys = jax.random.split(key, 16)
    k = iter(keys)

    def enc():
        return {
            'w1': 0.1 * jax.random.normal(next(k), (9 * c_in, c1), jnp.float32),
            'b1': 0.01 * jax.random.normal(next(k), (c1,), jnp.float32),
            'w2': 0.1 * jax.random.normal(next(k), (9 * c1, c2), jnp.float32),
            'b2': 0.01 * jax.random.normal(next(k), (c2,), jnp.float32),
        }

    params = {'encoder1': enc(), 'encoder2': enc()}
    params['combine'] = {
        'wf0': [0.1 * jax.random.normal(next(k), (c1, cf), jnp.float32),
                0.1 * jax.random.normal(next(k), (c2, cf), jnp.float32)],
        'wf1': [0.1 * jax.random.normal(next(k), (c1, cf), jnp.float32),
                0.1 * jax.random.normal(next(k), (c2, cf), jnp.float32)],
        'bf': [0.01 * jax.random.normal(next(k), (cf,), jnp.float32),
               0.01 * jax.random.normal(next(k), (cf,), jnp.float32)],
    }
    return params


def pack_params(p, share_weight=False, dtype=jnp.bfloat16):
    e1 = p['encoder1']
    e2 = p['encoder1'] if share_weight else p['encoder2']
    cmb = p['combine']
    c_in = e1['w1'].shape[0] // 9
    c1 = e1['w1'].shape[1]
    c2 = e1['w2'].shape[1]
    cf = cmb['wf0'][0].shape[1]

    # conv1: block-diagonal over the concatenated (t0 | t1) im2col features
    k1 = 9 * c_in
    w1 = jnp.zeros((2 * k1, 2 * c1), jnp.float32)
    w1 = w1.at[:k1, :c1].set(e1['w1']).at[k1:, c1:].set(e2['w1'])
    b1 = jnp.concatenate([e1['b1'], e2['b1']])

    # conv2: input channels of f1_both are [t0's c1 | t1's c1] per patch position
    w2a = e1['w2'].reshape(9, c1, c2)
    w2b = e2['w2'].reshape(9, c1, c2)
    w2 = jnp.zeros((9, 2 * c1, 2 * c2), jnp.float32)
    w2 = w2.at[:, :c1, :c2].set(w2a).at[:, c1:, c2:].set(w2b)
    w2 = w2.reshape(9 * 2 * c1, 2 * c2)
    b2 = jnp.concatenate([e1['b2'], e2['b2']])

    # MTF fuse weights: concat([t0, t1]) @ [W0; W1]
    wf = jnp.concatenate([cmb['wf0'][0], cmb['wf1'][0]], axis=0)   # (2*c1, cf)
    wc = jnp.concatenate([cmb['wf0'][1], cmb['wf1'][1]], axis=0)   # (2*c2, cf)

    return {
        'w1': w1.astype(dtype), 'b1': b1,
        'w2': w2.astype(dtype), 'b2': b2,
        'wf': wf.astype(dtype), 'bf': cmb['bf'][0],
        'wc': wc.astype(dtype), 'bc': cmb['bf'][1],
    }


if __name__ == "__main__":
    key = jax.random.PRNGKey(0)
    pkey, xkey = jax.random.split(key)
    raw_params = init_params(pkey)
    packed = pack_params(raw_params, share_weight=False)

    # img: (batch=2, channels=6 (two RGB frames), H=16, W=16), NCHW like torch
    img = jax.random.normal(xkey, (2, 6, 16, 16), jnp.float32)

    fwd = jax.jit(backbone_mtf_msf_forward)
    out = fwd(img, packed)
    jax.block_until_ready(out['out'])
    assert out['out'].shape == (2, 16, 16, 16)  # NCHW: (N, Cf, H, W)
    print("KERNEL_OK")
</pallas_src>

<mosaic_0001>
module attributes {stable_mosaic.version = 11 : i64} {
  func.func @_mm_bias_relu_kernel(%arg0: i32, %arg1: memref<256x54xbf16, #tpu.memory_space<vmem>>, %arg2: memref<54x32xbf16, #tpu.memory_space<vmem>>, %arg3: memref<1x32xf32, #tpu.memory_space<vmem>>, %arg4: memref<256x32xbf16, #tpu.memory_space<vmem>>) attributes {dimension_semantics = [#tpu.dimension_semantics<parallel>], iteration_bounds = array<i64: 2>, scalar_prefetch = 0 : i64, scratch_operands = 0 : i64, tpu.core_type = #tpu.core_type<tc>, window_params = [{transform_indices = @transform_0, window_bounds = array<i64: 256, 54>}, {pipeline_mode = #tpu.pipeline_mode<synchronous>, transform_indices = @transform_1, window_bounds = array<i64: 54, 32>}, {pipeline_mode = #tpu.pipeline_mode<synchronous>, transform_indices = @transform_2, window_bounds = array<i64: 1, 32>}, {transform_indices = @transform_3, window_bounds = array<i64: 256, 32>}]} {
    %c0 = arith.constant 0 : index
    %c0_0 = arith.constant 0 : index
    %0 = vector.load %arg1[%c0, %c0_0] : memref<256x54xbf16, #tpu.memory_space<vmem>>, vector<256x54xbf16>
    %c0_1 = arith.constant 0 : index
    %c0_2 = arith.constant 0 : index
    %1 = vector.load %arg2[%c0_1, %c0_2] : memref<54x32xbf16, #tpu.memory_space<vmem>>, vector<54x32xbf16>
    %cst = arith.constant dense<0.000000e+00> : vector<256x32xf32>
    %2 = tpu.matmul %0, %1, %cst {dimension_numbers = #tpu.dot_dimension_numbers<[1], [0], [0], [1], [0, 0, 1, 1], [], []>} : vector<256x54xbf16>, vector<54x32xbf16>, vector<256x32xf32> -> vector<256x32xf32>
    %c0_3 = arith.constant 0 : index
    %c0_4 = arith.constant 0 : index
    %3 = vector.load %arg3[%c0_3, %c0_4] : memref<1x32xf32, #tpu.memory_space<vmem>>, vector<1x32xf32>
    %4 = vector.broadcast %3 : vector<1x32xf32> to vector<256x32xf32>
    %5 = arith.addf %2, %4 : vector<256x32xf32>
    %cst_5 = arith.constant 0.000000e+00 : f32
    %6 = vector.broadcast %cst_5 : f32 to vector<256x32xf32>
    %7 = arith.maximumf %5, %6 : vector<256x32xf32>
    %8 = arith.truncf %7 : vector<256x32xf32> to vector<256x32xbf16>
    %c0_6 = arith.constant 0 : index
    %c0_7 = arith.constant 0 : index
    %9 = vector.load %arg4[%c0_6, %c0_7] : memref<256x32xbf16, #tpu.memory_space<vmem>>, vector<256x32xbf16>
    tpu.vector_store %arg4[%c0_6, %c0_7], %8 {strides = array<i32>} : memref<256x32xbf16, #tpu.memory_space<vmem>>, vector<256x32xbf16>,
    return
  }
  func.func @transform_0(%arg0: i32) -> (i32, i32) {
    %c0_i32 = arith.constant 0 : i32
    %c0_i32_0 = arith.constant 0 : i32
    return %arg0, %c0_i32 : i32, i32
  }
  func.func @transform_1(%arg0: i32) -> (i32, i32) {
    %c0_i32 = arith.constant 0 : i32
    %c0_i32_0 = arith.constant 0 : i32
    %c0_i32_1 = arith.constant 0 : i32
    return %c0_i32, %c0_i32_0 : i32, i32
  }
  func.func @transform_2(%arg0: i32) -> (i32, i32) {
    %c0_i32 = arith.constant 0 : i32
    %c0_i32_0 = arith.constant 0 : i32
    %c0_i32_1 = arith.constant 0 : i32
    return %c0_i32, %c0_i32_0 : i32, i32
  }
  func.func @transform_3(%arg0: i32) -> (i32, i32) {
    %c0_i32 = arith.constant 0 : i32
    %c0_i32_0 = arith.constant 0 : i32
    return %arg0, %c0_i32 : i32, i32
  }
}

module attributes {stable_mosaic.version = 11 : i64} {
  func.func @_conv2_coarse_fuse_kernel(%arg0: i32, %arg1: memref<128x288xbf16, #tpu.memory_space<vmem>>, %arg2: memref<288x64xbf16, #tpu.memory_space<vmem>>, %arg3: memref<1x64xf32, #tpu.memory_space<vmem>>, %arg4: memref<64x16xbf16, #tpu.memory_space<vmem>>, %arg5: memref<1x16xf32, #tpu.memory_space<vmem>>, %arg6: memref<128x16xbf16, #tpu.memory_space<vmem>>) attributes {dimension_semantics = [#tpu.dimension_semantics<arbitrary>], iteration_bounds = array<i64: 1>, scalar_prefetch = 0 : i64, scratch_operands = 0 : i64, tpu.core_type = #tpu.core_type<tc>, window_params = [{pipeline_mode = #tpu.pipeline_mode<synchronous>, transform_indices = @transform_0, window_bounds = array<i64: 128, 288>}, {pipeline_mode = #tpu.pipeline_mode<synchronous>, transform_indices = @transform_1, window_bounds = array<i64: 288, 64>}, {pipeline_mode = #tpu.pipeline_mode<synchronous>, transform_indices = @transform_2, window_bounds = array<i64: 1, 64>}, {pipeline_mode = #tpu.pipeline_mode<synchronous>, transform_indices = @transform_3, window_bounds = array<i64: 64, 16>}, {pipeline_mode = #tpu.pipeline_mode<synchronous>, transform_indices = @transform_4, window_bounds = array<i64: 1, 16>}, {pipeline_mode = #tpu.pipeline_mode<synchronous>, transform_indices = @transform_5, window_bounds = array<i64: 128, 16>}]} {
    %c0 = arith.constant 0 : index
    %c0_0 = arith.constant 0 : index
    %0 = vector.load %arg1[%c0, %c0_0] : memref<128x288xbf16, #tpu.memory_space<vmem>>, vector<128x288xbf16>
    %c0_1 = arith.constant 0 : index
    %c0_2 = arith.constant 0 : index
    %1 = vector.load %arg2[%c0_1, %c0_2] : memref<288x64xbf16, #tpu.memory_space<vmem>>, vector<288x64xbf16>
    %cst = arith.constant dense<0.000000e+00> : vector<128x64xf32>
    %2 = tpu.matmul %0, %1, %cst {dimension_numbers = #tpu.dot_dimension_numbers<[1], [0], [0], [1], [0, 0, 1, 1], [], []>} : vector<128x288xbf16>, vector<288x64xbf16>, vector<128x64xf32> -> vector<128x64xf32>
    %c0_3 = arith.constant 0 : index
    %c0_4 = arith.constant 0 : index
    %3 = vector.load %arg3[%c0_3, %c0_4] : memref<1x64xf32, #tpu.memory_space<vmem>>, vector<1x64xf32>
    %4 = vector.broadcast %3 : vector<1x64xf32> to vector<128x64xf32>
    %5 = arith.addf %2, %4 : vector<128x64xf32>
    %cst_5 = arith.constant 0.000000e+00 : f32
    %6 = vector.broadcast %cst_5 : f32 to vector<128x64xf32>
    %7 = arith.maximumf %5, %6 : vector<128x64xf32>
    %8 = arith.truncf %7 : vector<128x64xf32> to vector<128x64xbf16>
    %c0_6 = arith.constant 0 : index
    %c0_7 = arith.constant 0 : index
    %9 = vector.load %arg4[%c0_6, %c0_7] : memref<64x16xbf16, #tpu.memory_space<vmem>>, vector<64x16xbf16>
    %cst_8 = arith.constant dense<0.000000e+00> : vector<128x16xf32>
    %10 = tpu.matmul %8, %9, %cst_8 {dimension_numbers = #tpu.dot_dimension_numbers<[1], [0], [0], [1], [0, 0, 1, 1], [], []>} : vector<128x64xbf16>, vector<64x16xbf16>, vector<128x16xf32> -> vector<128x16xf32>
    %c0_9 = arith.constant 0 : index
    %c0_10 = arith.constant 0 : index
    %11 = vector.load %arg5[%c0_9, %c0_10] : memref<1x16xf32, #tpu.memory_space<vmem>>, vector<1x16xf32>
    %12 = vector.broadcast %11 : vector<1x16xf32> to vector<128x16xf32>
    %13 = arith.addf %10, %12 : vector<128x16xf32>
    %cst_11 = arith.constant 0.000000e+00 : f32
    %14 = vector.broadcast %cst_11 : f32 to vector<128x16xf32>
    %15 = arith.maximumf %13, %14 : vector<128x16xf32>
    %16 = arith.truncf %15 : vector<128x16xf32> to vector<128x16xbf16>
    %c0_12 = arith.constant 0 : index
    %c0_13 = arith.constant 0 : index
    %17 = vector.load %arg6[%c0_12, %c0_13] : memref<128x16xbf16, #tpu.memory_space<vmem>>, vector<128x16xbf16>
    tpu.vector_store %arg6[%c0_12, %c0_13], %16 {strides = array<i32>} : memref<128x16xbf16, #tpu.memory_space<vmem>>, vector<128x16xbf16>,
    return
  }
  func.func @transform_0(%arg0: i32) -> (i32, i32) {
    %c0_i32 = arith.constant 0 : i32
    %c0_i32_0 = arith.constant 0 : i32
    %c0_i32_1 = arith.constant 0 : i32
    return %c0_i32, %c0_i32_0 : i32, i32
  }
  func.func @transform_1(%arg0: i32) -> (i32, i32) {
    %c0_i32 = arith.constant 0 : i32
    %c0_i32_0 = arith.constant 0 : i32
    %c0_i32_1 = arith.constant 0 : i32
    return %c0_i32, %c0_i32_0 : i32, i32
  }
  func.func @transform_2(%arg0: i32) -> (i32, i32) {
    %c0_i32 = arith.constant 0 : i32
    %c0_i32_0 = arith.constant 0 : i32
    %c0_i32_1 = arith.constant 0 : i32
    return %c0_i32, %c0_i32_0 : i32, i32
  }
  func.func @transform_3(%arg0: i32) -> (i32, i32) {
    %c0_i32 = arith.constant 0 : i32
    %c0_i32_0 = arith.constant 0 : i32
    %c0_i32_1 = arith.constant 0 : i32
    return %c0_i32, %c0_i32_0 : i32, i32
  }
  func.func @transform_4(%arg0: i32) -> (i32, i32) {
    %c0_i32 = arith.constant 0 : i32
    %c0_i32_0 = arith.constant 0 : i32
    %c0_i32_1 = arith.constant 0 : i32
    return %c0_i32, %c0_i32_0 : i32, i32
  }
  func.func @transform_5(%arg0: i32) -> (i32, i32) {
    %c0_i32 = arith.constant 0 : i32
    %c0_i32_0 = arith.constant 0 : i32
    %c0_i32_1 = arith.constant 0 : i32
    return %c0_i32, %c0_i32_0 : i32, i32
  }
}

module attributes {stable_mosaic.version = 11 : i64} {
  func.func @_fine_fuse_add_kernel(%arg0: i32, %arg1: memref<256x32xbf16, #tpu.memory_space<vmem>>, %arg2: memref<32x16xbf16, #tpu.memory_space<vmem>>, %arg3: memref<1x16xf32, #tpu.memory_space<vmem>>, %arg4: memref<256x16xbf16, #tpu.memory_space<vmem>>, %arg5: memref<256x16xf32, #tpu.memory_space<vmem>>) attributes {dimension_semantics = [#tpu.dimension_semantics<parallel>], iteration_bounds = array<i64: 2>, scalar_prefetch = 0 : i64, scratch_operands = 0 : i64, tpu.core_type = #tpu.core_type<tc>, window_params = [{transform_indices = @transform_0, window_bounds = array<i64: 256, 32>}, {pipeline_mode = #tpu.pipeline_mode<synchronous>, transform_indices = @transform_1, window_bounds = array<i64: 32, 16>}, {pipeline_mode = #tpu.pipeline_mode<synchronous>, transform_indices = @transform_2, window_bounds = array<i64: 1, 16>}, {transform_indices = @transform_3, window_bounds = array<i64: 256, 16>}, {transform_indices = @transform_4, window_bounds = array<i64: 256, 16>}]} {
    %c0 = arith.constant 0 : index
    %c0_0 = arith.constant 0 : index
    %0 = vector.load %arg1[%c0, %c0_0] : memref<256x32xbf16, #tpu.memory_space<vmem>>, vector<256x32xbf16>
    %c0_1 = arith.constant 0 : index
    %c0_2 = arith.constant 0 : index
    %1 = vector.load %arg2[%c0_1, %c0_2] : memref<32x16xbf16, #tpu.memory_space<vmem>>, vector<32x16xbf16>
    %cst = arith.constant dense<0.000000e+00> : vector<256x16xf32>
    %2 = tpu.matmul %0, %1, %cst {dimension_numbers = #tpu.dot_dimension_numbers<[1], [0], [0], [1], [0, 0, 1, 1], [], []>} : vector<256x32xbf16>, vector<32x16xbf16>, vector<256x16xf32> -> vector<256x16xf32>
    %c0_3 = arith.constant 0 : index
    %c0_4 = arith.constant 0 : index
    %3 = vector.load %arg3[%c0_3, %c0_4] : memref<1x16xf32, #tpu.memory_space<vmem>>, vector<1x16xf32>
    %4 = vector.broadcast %3 : vector<1x16xf32> to vector<256x16xf32>
    %5 = arith.addf %2, %4 : vector<256x16xf32>
    %cst_5 = arith.constant 0.000000e+00 : f32
    %6 = vector.broadcast %cst_5 : f32 to vector<256x16xf32>
    %7 = arith.maximumf %5, %6 : vector<256x16xf32>
    %c0_6 = arith.constant 0 : index
    %c0_7 = arith.constant 0 : index
    %8 = vector.load %arg4[%c0_6, %c0_7] : memref<256x16xbf16, #tpu.memory_space<vmem>>, vector<256x16xbf16>
    %9 = arith.extf %8 : vector<256x16xbf16> to vector<256x16xf32>
    %10 = arith.addf %7, %9 : vector<256x16xf32>
    %c0_8 = arith.constant 0 : index
    %c0_9 = arith.constant 0 : index
    %11 = vector.load %arg5[%c0_8, %c0_9] : memref<256x16xf32, #tpu.memory_space<vmem>>, vector<256x16xf32>
    tpu.vector_store %arg5[%c0_8, %c0_9], %10 {strides = array<i32>} : memref<256x16xf32, #tpu.memory_space<vmem>>, vector<256x16xf32>,
    return
  }
  func.func @transform_0(%arg0: i32) -> (i32, i32) {
    %c0_i32 = arith.constant 0 : i32
    %c0_i32_0 = arith.constant 0 : i32
    return %arg0, %c0_i32 : i32, i32
  }
  func.func @transform_1(%arg0: i32) -> (i32, i32) {
    %c0_i32 = arith.constant 0 : i32
    %c0_i32_0 = arith.constant 0 : i32
    %c0_i32_1 = arith.constant 0 : i32
    return %c0_i32, %c0_i32_0 : i32, i32
  }
  func.func @transform_2(%arg0: i32) -> (i32, i32) {
    %c0_i32 = arith.constant 0 : i32
    %c0_i32_0 = arith.constant 0 : i32
    %c0_i32_1 = arith.constant 0 : i32
    return %c0_i32, %c0_i32_0 : i32, i32
  }
  func.func @transform_3(%arg0: i32) -> (i32, i32) {
    %c0_i32 = arith.constant 0 : i32
    %c0_i32_0 = arith.constant 0 : i32
    return %arg0, %c0_i32 : i32, i32
  }
  func.func @transform_4(%arg0: i32) -> (i32, i32) {
    %c0_i32 = arith.constant 0 : i32
    %c0_i32_0 = arith.constant 0 : i32
    return %arg0, %c0_i32 : i32, i32
  }
}

</mosaic_0001>

<bundles_post_ra>
// kernel: backbone_mtf_msf_forward.3
= control target key start
LH: loop header
LB: loop body
LE: loop exit
PB: predicated region body
PF: predicated region fallthrough
CT: control target
= control target key end

     0   :  { %s1023_s12 = smov 0   ;;  %s1196_s0 = inlined_call_operand.vmem [shape: bf16[512,54], index: 0, kind: input, shape index: {}]   ;;  %s1197_s1 = inlined_call_operand.vmem [shape: bf16[54,32], index: 1, kind: input, shape index: {}]   ;;  %s1198_s2 = inlined_call_operand.vmem [shape: f32[1,32], index: 2, kind: input, shape index: {}]   ;;  %s1199_s3 = inlined_call_operand.vmem [shape: bf16[512,32], index: 3, kind: output, shape index: {}]  }
   0x1 LB: > { %s785_s13 = sadd.s32 4294967295, %s1001_s12   ;;  %p789_p0 = scmp.ge.s32.totalorder %s1001_s12, 1  ;;  %s1001_s12 = sphi %s1023_s12, %s13_s12  }
   0x2   : > { %p138_p1 = scmp.lt.s32.totalorder %s1001_s12, 3 }
   0x4   : > { %p139_p2 = pnand %p789_p0, %p138_p1 }
   0x5   : > { %v975_v0 = vld [vmem:[%s1197_s1] sm:$0xff] (!%p139_p2)   ;;  %v976_v1 = vld [vmem:[%s1197_s1 + $0x8] sm:$0xff] (!%p139_p2)   ;;  %s790_s18 = sshll.u32 (!%p139_p2), %s785_s13, 5  ;;  %v977_v2 = vld [vmem:[%s1197_s1 + $0x10] sm:$0xff] (!%p139_p2)   ;;  %vm322_vm0 = vcmask (!%p139_p2), 441344   ;;  %vm371_vm1 = vcmask (!%p139_p2), 1042432  }
   0x6   : > { %142 = sbr.rel (%p139_p2) target bundleno = 268 (0x10c), region = 32  ;;  %917 = vmatprep.subr.bf16.mxu0 (!%p139_p2), %v975_v0  ;;  %957 = vmatprep.subr.bf16.mxu1 (!%p139_p2), %v975_v0  ;;  %p163_p3 = scmp.lt.s32.totalorder (!%p139_p2), %s790_s18, 63  ;;  %v978_v3 = vld [vmem:[%s1197_s1 + $0x18] ss:$0 sps:$4 sm:$0x77] (!%p139_p2)   ;;  %vm696_vm2 = vcmask (!%p139_p2), 257024  }
   0x7   : > { %918 = vmatpush3.bf16.msra.mxu0 (!%p139_p2), %v975_v0  ;;  %961 = vmatpush3.bf16.msra.mxu1 (!%p139_p2), %v975_v0  ;;  %v373_v6 = vsel (!%p139_p2), %vm371_vm1, %v978_v3, 0  ;;  %v1088_v21 = vld [vmem:[%s1198_s2] ss:$0 sm:$0xff] (!%p139_p2) }
   0x8   : > { %919 = vmatprep.subr.bf16.mxu0 (!%p139_p2), %v976_v1  ;;  %958 = vmatprep.subr.bf16.mxu1 (!%p139_p2), %v976_v1 }
   0xb   : > { %920 = vmatpush3.bf16.msra.mxu0 (!%p139_p2), %v976_v1  ;;  %962 = vmatpush3.bf16.msra.mxu1 (!%p139_p2), %v976_v1 }
   0xc   : > { %921 = vmatprep.subr.bf16.mxu0 (!%p139_p2), %v977_v2  ;;  %959 = vmatprep.subr.bf16.mxu1 (!%p139_p2), %v977_v2 }
   0xd   : > { %s1201_s18 = smov (!%p163_p3, %s790_s18), 63 }
   0xe   : > { %s791_s21 = sshll.u32 %s1201_s18, 2 }
   0xf   : > { %s1051_s26 = scalar_lea.vmem %s1196_s0, %s791_s21  ;;  %922 = vmatpush3.bf16.msra.mxu0 %v977_v2  ;;  %963 = vmatpush3.bf16.msra.mxu1 %v977_v2  ;;  %s1101_s4 = scalar_lea.vmem %s1199_s3, %s791_s21 }
  0x10   : > { %v979_v4 = vld [vmem:[%s1051_s26] sm:$0xff]   ;;  %965 = vmatprep.subr.msk.bf16.mxu0 %vm371_vm1, %v978_v3  ;;  %966 = vmatprep.subr.msk.bf16.mxu1 %vm371_vm1, %v978_v3  ;;  %v981_v7 = vld [vmem:[%s1051_s26 + $0x8] sm:$0xff]   ;;  %v983_v9 = vld [vmem:[%s1051_s26 + $0x10] sm:$0xff]  }
  0x11   : > { %v980_v5 = vld [vmem:[%s1051_s26 + $0x40] sm:$0xff]   ;;  %925 = vmatprep.mubr.msk.bf16.mxu0 %vm322_vm0, %v979_v4  ;;  %v982_v8 = vld [vmem:[%s1051_s26 + $0x48] sm:$0xff]   ;;  %v984_v10 = vld [vmem:[%s1051_s26 + $0x50] sm:$0xff]  }
  0x12   : > { %941 = vmatprep.mubr.msk.bf16.mxu1 %vm322_vm0, %v980_v5  ;;  %v985_v11 = vld [vmem:[%s1051_s26 + $0x18] sm:$0xff]   ;;  %v987_v13 = vld [vmem:[%s1051_s26 + $0x20] sm:$0xff]   ;;  %v989_v15 = vld [vmem:[%s1051_s26 + $0x28] sm:$0xff]  }
  0x13   : > { %924 = vmatpush3.bf16.msra.mxu0 %v373_v6  ;;  %964 = vmatpush3.bf16.msra.mxu1 %v373_v6  ;;  %v986_v12 = vld [vmem:[%s1051_s26 + $0x58] sm:$0xff]   ;;  %v988_v14 = vld [vmem:[%s1051_s26 + $0x60] sm:$0xff]   ;;  %v990_v16 = vld [vmem:[%s1051_s26 + $0x68] sm:$0xff]  }
  0x14   : > { %v991_v17 = vld [vmem:[%s1051_s26 + $0x30] sm:$0xff]   ;;  %v993_v19 = vld [vmem:[%s1051_s26 + $0x38] sm:$0xff]  }
  0x15   : > { %v992_v18 = vld [vmem:[%s1051_s26 + $0x70] sm:$0xff]   ;;  %v994_v20 = vld [vmem:[%s1051_s26 + $0x78] sm:$0xff]  }
  0x16   : > { %926 = vmatmul.mubr.msk.bf16.vlgmr.msra.gmra.mrb[0].mxu0 %vm322_vm0, %v981_v7  ;;  %942 = vmatmul.mubr.msk.bf16.vlgmr.msra.gmra.mrb[0].mxu1 %vm322_vm0, %v982_v8 }
  0x17   : > { %929 = vmatprep.mubr.msk.bf16.mxu0 %vm322_vm0, %v983_v9  ;;  %945 = vmatprep.mubr.msk.bf16.mxu1 %vm322_vm0, %v984_v10 }
  0x1e   : > { %930 = vmatmul.mubr.msk.bf16.gmra.mrb[4].mxu0 %vm322_vm0, %v985_v11  ;;  %946 = vmatmul.mubr.msk.bf16.gmra.mrb[4].mxu1 %vm322_vm0, %v986_v12 }
  0x1f   : > { %933 = vmatprep.mubr.msk.bf16.mxu0 %vm322_vm0, %v987_v13  ;;  %949 = vmatprep.mubr.msk.bf16.mxu1 %vm322_vm0, %v988_v14 }
  0x26   : > { %934 = vmatmul.mubr.msk.bf16.gmra.mrb[8].mxu0 %vm322_vm0, %v989_v15  ;;  %950 = vmatmul.mubr.msk.bf16.gmra.mrb[8].mxu1 %vm322_vm0, %v990_v16 }
  0x27   : > { %937 = vmatprep.mubr.msk.bf16.mxu0 %vm322_vm0, %v991_v17  ;;  %953 = vmatprep.mubr.msk.bf16.mxu1 %vm322_vm0, %v992_v18 }
  0x2e   : > { %938 = vmatmul.mubr.msk.bf16.gmra.mrb[12].mxu0 %vm322_vm0, %v993_v19  ;;  %954 = vmatmul.mubr.msk.bf16.gmra.mrb[12].mxu1 %vm322_vm0, %v994_v20 }
  0xe9   : > { %v927_v22 = vpop.f32.mrb[0].mxu0  ;;  %v943_v23 = vpop.f32.mrb[0].mxu1 }
  0xea   : > { %v418_v24 = vadd.f32 %v927_v22, %v1088_v21  ;;  %v482_v25 = vadd.f32 %v943_v23, %v1088_v21  ;;  %v409_v26 = vpop.f32.mrb[1].mxu0  ;;  %v473_v27 = vpop.f32.mrb[1].mxu1 }
  0xeb   : > { %v410_v28 = vadd.f32 %v1088_v21, %v409_v26  ;;  %v474_v29 = vadd.f32 %v1088_v21, %v473_v27  ;;  %v928_v30 = vpop.f32.mrb[2].mxu0  ;;  %v944_v31 = vpop.f32.mrb[2].mxu1 }
  0xec   : > { %v538_v32 = vmax.f32 %v418_v24, 0.0  ;;  %v554_v33 = vmax.f32 %v482_v25, 0.0  ;;  %v421_v34 = vadd.f32 %v928_v30, %v1088_v21  ;;  %v485_v35 = vadd.f32 %v944_v31, %v1088_v21  ;;  %v412_v36 = vpop.f32.mrb[3].mxu0  ;;  %v476_v37 = vpop.f32.mrb[3].mxu1 }
  0xed   : > { %v536_v38 = vmax.f32 %v410_v28, 0.0  ;;  %v552_v39 = vmax.f32 %v474_v29, 0.0  ;;  %v413_v40 = vadd.f32 %v1088_v21, %v412_v36  ;;  %v477_v41 = vadd.f32 %v1088_v21, %v476_v37 }
  0xee   : > { %v867_v42 = vpack.c.bf16 %v538_v32, %v538_v32  ;;  %v883_v43 = vpack.c.bf16 %v554_v33, %v554_v33  ;;  %v539_v44 = vmax.f32 %v421_v34, 0.0  ;;  %v555_v45 = vmax.f32 %v485_v35, 0.0 }
  0xef   : > { %v865_v46 = vpack.c.bf16 %v536_v38, %v536_v38  ;;  %v881_v47 = vpack.c.bf16 %v552_v39, %v552_v39  ;;  %v537_v48 = vmax.f32 %v413_v40, 0.0  ;;  %v553_v49 = vmax.f32 %v477_v41, 0.0 }
  0xf0   : > { %699 = vst.msk [vmem:[%s1101_s4 + $0x8] sm:$0xf] %vm696_vm2, %v867_v42  ;;  %715 = vst.msk [vmem:[%s1101_s4 + $0x48] sm:$0xf] %vm696_vm2, %v883_v43  ;;  %v868_v50 = vpack.c.bf16 %v539_v44, %v539_v44  ;;  %v884_v51 = vpack.c.bf16 %v555_v45, %v555_v45 }
  0xf1   : > { %697 = vst.msk [vmem:[%s1101_s4] sm:$0xf] %vm696_vm2, %v865_v46  ;;  %713 = vst.msk [vmem:[%s1101_s4 + $0x40] sm:$0xf] %vm696_vm2, %v881_v47  ;;  %v866_v52 = vpack.c.bf16 %v537_v48, %v537_v48  ;;  %v882_v53 = vpack.c.bf16 %v553_v49, %v553_v49  ;;  %v931_v54 = vpop.f32.mrb[4].mxu0  ;;  %v947_v55 = vpop.f32.mrb[4].mxu1 }
  0xf2   : > { %700 = vst.msk [vmem:[%s1101_s4 + $0xc] sm:$0xf] %vm696_vm2, %v868_v50  ;;  %716 = vst.msk [vmem:[%s1101_s4 + $0x4c] sm:$0xf] %vm696_vm2, %v884_v51  ;;  %v434_v56 = vadd.f32 %v931_v54, %v1088_v21  ;;  %v498_v57 = vadd.f32 %v947_v55, %v1088_v21  ;;  %v425_v58 = vpop.f32.mrb[5].mxu0  ;;  %v489_v59 = vpop.f32.mrb[5].mxu1 }
  0xf3   : > { %698 = vst.msk [vmem:[%s1101_s4 + $0x4] sm:$0xf] %vm696_vm2, %v866_v52  ;;  %714 = vst.msk [vmem:[%s1101_s4 + $0x44] sm:$0xf] %vm696_vm2, %v882_v53  ;;  %v426_v60 = vadd.f32 %v1088_v21, %v425_v58  ;;  %v490_v61 = vadd.f32 %v1088_v21, %v489_v59  ;;  %v932_v62 = vpop.f32.mrb[6].mxu0  ;;  %v948_v63 = vpop.f32.mrb[6].mxu1 }
  0xf4   : > { %v542_v0 = vmax.f32 %v434_v56, 0.0  ;;  %v558_v1 = vmax.f32 %v498_v57, 0.0  ;;  %v437_v2 = vadd.f32 %v932_v62, %v1088_v21  ;;  %v501_v3 = vadd.f32 %v948_v63, %v1088_v21  ;;  %v428_v4 = vpop.f32.mrb[7].mxu0  ;;  %v492_v5 = vpop.f32.mrb[7].mxu1 }
  0xf5   : > { %v540_v6 = vmax.f32 %v426_v60, 0.0  ;;  %v556_v7 = vmax.f32 %v490_v61, 0.0  ;;  %v429_v8 = vadd.f32 %v1088_v21, %v428_v4  ;;  %v493_v9 = vadd.f32 %v1088_v21, %v492_v5 }
  0xf6   : > { %v871_v10 = vpack.c.bf16 %v542_v0, %v542_v0  ;;  %v887_v11 = vpack.c.bf16 %v558_v1, %v558_v1  ;;  %v543_v12 = vmax.f32 %v437_v2, 0.0  ;;  %v559_v13 = vmax.f32 %v501_v3, 0.0 }
  0xf7   : > { %v869_v14 = vpack.c.bf16 %v540_v6, %v540_v6  ;;  %v885_v15 = vpack.c.bf16 %v556_v7, %v556_v7  ;;  %v541_v16 = vmax.f32 %v429_v8, 0.0  ;;  %v557_v17 = vmax.f32 %v493_v9, 0.0 }
  0xf8   : > { %703 = vst.msk [vmem:[%s1101_s4 + $0x18] sm:$0xf] %vm696_vm2, %v871_v10  ;;  %719 = vst.msk [vmem:[%s1101_s4 + $0x58] sm:$0xf] %vm696_vm2, %v887_v11  ;;  %v872_v18 = vpack.c.bf16 %v543_v12, %v543_v12  ;;  %v888_v19 = vpack.c.bf16 %v559_v13, %v559_v13 }
  0xf9   : > { %701 = vst.msk [vmem:[%s1101_s4 + $0x10] sm:$0xf] %vm696_vm2, %v869_v14  ;;  %717 = vst.msk [vmem:[%s1101_s4 + $0x50] sm:$0xf] %vm696_vm2, %v885_v15  ;;  %v870_v20 = vpack.c.bf16 %v541_v16, %v541_v16  ;;  %v886_v22 = vpack.c.bf16 %v557_v17, %v557_v17  ;;  %v935_v23 = vpop.f32.mrb[8].mxu0  ;;  %v951_v24 = vpop.f32.mrb[8].mxu1 }
  0xfa   : > { %704 = vst.msk [vmem:[%s1101_s4 + $0x1c] sm:$0xf] %vm696_vm2, %v872_v18  ;;  %720 = vst.msk [vmem:[%s1101_s4 + $0x5c] sm:$0xf] %vm696_vm2, %v888_v19  ;;  %v450_v25 = vadd.f32 %v935_v23, %v1088_v21  ;;  %v514_v26 = vadd.f32 %v951_v24, %v1088_v21  ;;  %v441_v27 = vpop.f32.mrb[9].mxu0  ;;  %v505_v28 = vpop.f32.mrb[9].mxu1 }
  0xfb   : > { %702 = vst.msk [vmem:[%s1101_s4 + $0x14] sm:$0xf] %vm696_vm2, %v870_v20  ;;  %718 = vst.msk [vmem:[%s1101_s4 + $0x54] sm:$0xf] %vm696_vm2, %v886_v22  ;;  %v442_v29 = vadd.f32 %v1088_v21, %v441_v27  ;;  %v506_v30 = vadd.f32 %v1088_v21, %v505_v28  ;;  %v936_v31 = vpop.f32.mrb[10].mxu0  ;;  %v952_v32 = vpop.f32.mrb[10].mxu1 }
  0xfc   : > { %v546_v33 = vmax.f32 %v450_v25, 0.0  ;;  %v562_v34 = vmax.f32 %v514_v26, 0.0  ;;  %v453_v35 = vadd.f32 %v936_v31, %v1088_v21  ;;  %v517_v36 = vadd.f32 %v952_v32, %v1088_v21  ;;  %v444_v37 = vpop.f32.mrb[11].mxu0  ;;  %v508_v38 = vpop.f32.mrb[11].mxu1 }
  0xfd   : > { %v544_v39 = vmax.f32 %v442_v29, 0.0  ;;  %v560_v40 = vmax.f32 %v506_v30, 0.0  ;;  %v445_v41 = vadd.f32 %v1088_v21, %v444_v37  ;;  %v509_v42 = vadd.f32 %v1088_v21, %v508_v38 }
  0xfe   : > { %v875_v43 = vpack.c.bf16 %v546_v33, %v546_v33  ;;  %v891_v44 = vpack.c.bf16 %v562_v34, %v562_v34  ;;  %v547_v45 = vmax.f32 %v453_v35, 0.0  ;;  %v563_v46 = vmax.f32 %v517_v36, 0.0 }
  0xff   : > { %v873_v47 = vpack.c.bf16 %v544_v39, %v544_v39  ;;  %v889_v48 = vpack.c.bf16 %v560_v40, %v560_v40  ;;  %v545_v49 = vmax.f32 %v445_v41, 0.0  ;;  %v561_v50 = vmax.f32 %v509_v42, 0.0 }
 0x100   : > { %707 = vst.msk [vmem:[%s1101_s4 + $0x28] sm:$0xf] %vm696_vm2, %v875_v43  ;;  %723 = vst.msk [vmem:[%s1101_s4 + $0x68] sm:$0xf] %vm696_vm2, %v891_v44  ;;  %v876_v51 = vpack.c.bf16 %v547_v45, %v547_v45  ;;  %v892_v52 = vpack.c.bf16 %v563_v46, %v563_v46 }
 0x101   : > { %705 = vst.msk [vmem:[%s1101_s4 + $0x20] sm:$0xf] %vm696_vm2, %v873_v47  ;;  %721 = vst.msk [vmem:[%s1101_s4 + $0x60] sm:$0xf] %vm696_vm2, %v889_v48  ;;  %v874_v53 = vpack.c.bf16 %v545_v49, %v545_v49  ;;  %v890_v54 = vpack.c.bf16 %v561_v50, %v561_v50  ;;  %v939_v55 = vpop.f32.mrb[12].mxu0  ;;  %v955_v56 = vpop.f32.mrb[12].mxu1 }
 0x102   : > { %708 = vst.msk [vmem:[%s1101_s4 + $0x2c] sm:$0xf] %vm696_vm2, %v876_v51  ;;  %724 = vst.msk [vmem:[%s1101_s4 + $0x6c] sm:$0xf] %vm696_vm2, %v892_v52  ;;  %v466_v57 = vadd.f32 %v939_v55, %v1088_v21  ;;  %v530_v58 = vadd.f32 %v955_v56, %v1088_v21  ;;  %v457_v59 = vpop.f32.mrb[13].mxu0  ;;  %v521_v60 = vpop.f32.mrb[13].mxu1 }
 0x103   : > { %706 = vst.msk [vmem:[%s1101_s4 + $0x24] sm:$0xf] %vm696_vm2, %v874_v53  ;;  %722 = vst.msk [vmem:[%s1101_s4 + $0x64] sm:$0xf] %vm696_vm2, %v890_v54  ;;  %v458_v61 = vadd.f32 %v1088_v21, %v457_v59  ;;  %v522_v62 = vadd.f32 %v1088_v21, %v521_v60  ;;  %v940_v63 = vpop.f32.mrb[14].mxu0  ;;  %v956_v0 = vpop.f32.mrb[14].mxu1 }
 0x104   : > { %v550_v1 = vmax.f32 %v466_v57, 0.0  ;;  %v566_v2 = vmax.f32 %v530_v58, 0.0  ;;  %v469_v3 = vadd.f32 %v940_v63, %v1088_v21  ;;  %v533_v4 = vadd.f32 %v956_v0, %v1088_v21  ;;  %v460_v5 = vpop.f32.mrb[15].mxu0  ;;  %v524_v6 = vpop.f32.mrb[15].mxu1 }
 0x105   : > { %v548_v7 = vmax.f32 %v458_v61, 0.0  ;;  %v564_v8 = vmax.f32 %v522_v62, 0.0  ;;  %v461_v9 = vadd.f32 %v1088_v21, %v460_v5  ;;  %v525_v10 = vadd.f32 %v1088_v21, %v524_v6 }
 0x106   : > { %v879_v11 = vpack.c.bf16 %v550_v1, %v550_v1  ;;  %v895_v12 = vpack.c.bf16 %v566_v2, %v566_v2  ;;  %v551_v13 = vmax.f32 %v469_v3, 0.0  ;;  %v567_v14 = vmax.f32 %v533_v4, 0.0 }
 0x107   : > { %v877_v15 = vpack.c.bf16 %v548_v7, %v548_v7  ;;  %v893_v16 = vpack.c.bf16 %v564_v8, %v564_v8  ;;  %v549_v17 = vmax.f32 %v461_v9, 0.0  ;;  %v565_v18 = vmax.f32 %v525_v10, 0.0 }
 0x108   : > { %711 = vst.msk [vmem:[%s1101_s4 + $0x38] sm:$0xf] %vm696_vm2, %v879_v11  ;;  %727 = vst.msk [vmem:[%s1101_s4 + $0x78] sm:$0xf] %vm696_vm2, %v895_v12  ;;  %v880_v19 = vpack.c.bf16 %v551_v13, %v551_v13  ;;  %v896_v20 = vpack.c.bf16 %v567_v14, %v567_v14 }
 0x109   : > { %709 = vst.msk [vmem:[%s1101_s4 + $0x30] sm:$0xf] %vm696_vm2, %v877_v15  ;;  %725 = vst.msk [vmem:[%s1101_s4 + $0x70] sm:$0xf] %vm696_vm2, %v893_v16  ;;  %v878_v21 = vpack.c.bf16 %v549_v17, %v549_v17  ;;  %v894_v22 = vpack.c.bf16 %v565_v18, %v565_v18 }
 0x10a   : > { %712 = vst.msk [vmem:[%s1101_s4 + $0x3c] sm:$0xf] %vm696_vm2, %v880_v19  ;;  %728 = vst.msk [vmem:[%s1101_s4 + $0x7c] sm:$0xf] %vm696_vm2, %v896_v20 }
 0x10b   : > { %710 = vst.msk [vmem:[%s1101_s4 + $0x34] sm:$0xf] %vm696_vm2, %v878_v21  ;;  %726 = vst.msk [vmem:[%s1101_s4 + $0x74] sm:$0xf] %vm696_vm2, %v894_v22 }
 0x10c PF: > { %s13_s12 = sadd.s32 1, %s1001_s12  }
 0x10d   : > { %p10_p4 = scmp.ge.s32.totalorder %s13_s12, 4  }
 0x10f   :  { %12 = sbr.rel (!%p10_p4) target bundleno = 1 (0x1), region = 62 }

// kernel: backbone_mtf_msf_forward.4
= control target key start
LH: loop header
LB: loop body
LE: loop exit
PB: predicated region body
PF: predicated region fallthrough
CT: control target
= control target key end

     0   :  { %vm324_vm0 = vcmask 261120   ;;  %vm606_vm1 = vcmask 523264   ;;  %vm808_vm2 = vcmask 125952   ;;  %s1417_s1 = inlined_call_operand.vmem [shape: bf16[288,64], index: 1, kind: input, shape index: {}]   ;;  %s1418_s0 = inlined_call_operand.vmem [shape: bf16[128,288], index: 0, kind: input, shape index: {}]   ;;  %s1419_s3 = inlined_call_operand.vmem [shape: bf16[64,16], index: 3, kind: input, shape index: {}]   ;;  %s1420_s2 = inlined_call_operand.vmem [shape: f32[1,64], index: 2, kind: input, shape index: {}]   ;;  %s1421_s4 = inlined_call_operand.vmem [shape: f32[1,16], index: 4, kind: input, shape index: {}]   ;;  %s1422_s5 = inlined_call_operand.vmem [shape: bf16[128,16], index: 5, kind: output, shape index: {}]  }
   0x1   :  { %v1055_v0 = vld [vmem:[%s1417_s1 + $0x40] sm:$0xff]   ;;  %v1057_v2 = vld [vmem:[%s1417_s1 + $0x48] sm:$0xff]   ;;  %v1059_v4 = vld [vmem:[%s1417_s1 + $0x50] sm:$0xff]  }
   0x2   :  { %v1056_v1 = vld [vmem:[%s1417_s1] sm:$0xff]   ;;  %925 = vmatprep.subr.bf16.mxu0 %v1055_v0  ;;  %v1058_v3 = vld [vmem:[%s1417_s1 + $0x8] sm:$0xff]   ;;  %v1060_v5 = vld [vmem:[%s1417_s1 + $0x10] sm:$0xff]  }
   0x3   :  { %926 = vmatpush3.bf16.msra.mxu0 %v1056_v1  ;;  %v1061_v6 = vld [vmem:[%s1417_s1 + $0x58] sm:$0xff]   ;;  %v1063_v8 = vld [vmem:[%s1417_s1 + $0x60] sm:$0xff]   ;;  %v1065_v11 = vld [vmem:[%s1417_s1 + $0x68] sm:$0xff]  }
   0x4   :  { %927 = vmatprep.subr.bf16.mxu0 %v1057_v2  ;;  %v1062_v7 = vld [vmem:[%s1417_s1 + $0x18] sm:$0xff]   ;;  %v1064_v9 = vld [vmem:[%s1417_s1 + $0x20] sm:$0xff]   ;;  %v1066_v12 = vld [vmem:[%s1417_s1 + $0x28] sm:$0xff]  }
   0x5   :  { %v1070_v10 = vld [vmem:[%s1417_s1 + $0x80] sm:$0xff]   ;;  %v1067_v13 = vld [vmem:[%s1417_s1 + $0x70] sm:$0xff]   ;;  %v1075_v15 = vld [vmem:[%s1417_s1 + $0x88] sm:$0xff]  }
   0x6   :  { %1011 = vmatprep.subr.bf16.mxu1 %v1070_v10  ;;  %v1074_v14 = vld [vmem:[%s1418_s0 + $0x4] ss:$12 sps:$4 sm:$0xff]   ;;  %v1076_v16 = vld [vmem:[%s1418_s0 + $0x8] ss:$12 sps:$4 sm:$0xff]   ;;  %v1077_v17 = vld [vmem:[%s1418_s0 + $0x20] ss:$12 sps:$4 sm:$0xff]  }
   0x7   :  { %928 = vmatpush3.bf16.msra.mxu0 %v1058_v3  ;;  %1012 = vmatpush3.bf16.msra.mxu1 %v1070_v10  ;;  %v1068_v18 = vld [vmem:[%s1417_s1 + $0x30] sm:$0xff]   ;;  %v1069_v19 = vld [vmem:[%s1417_s1 + $0x78] sm:$0xff]   ;;  %v1072_v22 = vld [vmem:[%s1418_s0] ss:$12 sps:$4 sm:$0xff]  }
   0x8   :  { %929 = vmatprep.subr.bf16.mxu0 %v1059_v4  ;;  %381 = vmatprep.mubr.bf16.mxu0 %v1074_v14  ;;  %v1084_v20 = vld [vmem:[%s1418_s0 + $0x38] ss:$12 sps:$4 sm:$0xff]   ;;  %v1085_v23 = vld [vmem:[%s1418_s0 + $0x50] ss:$12 sps:$4 sm:$0xff]   ;;  %v1092_v24 = vld [vmem:[%s1418_s0 + $0x68] ss:$12 sps:$4 sm:$0xff]  }
   0x9   :  { %1013 = vmatprep.subr.bf16.mxu1 %v1075_v15  ;;  %1015 = vmatprep.mubr.msk.bf16.mxu1 %vm324_vm0, %v1076_v16  ;;  %v1071_v21 = vld [vmem:[%s1417_s1 + $0x38] sm:$0xff]   ;;  %v1093_v26 = vld [vmem:[%s1418_s0 + $0x80] ss:$12 sps:$4 sm:$0xff]   ;;  %v1088_v33 = vld [vmem:[%s1418_s0 + $0x48] ss:$12 sps:$4 sm:$0xff]  }
   0xa   :  { %v1078_v25 = vld [vmem:[%s1418_s0 + $0x1c] ss:$12 sps:$4 sm:$0xff]   ;;  %v1080_v27 = vld [vmem:[%s1418_s0 + $0x18] ss:$12 sps:$4 sm:$0xff]   ;;  %v1081_v29 = vld [vmem:[%s1418_s0 + $0x34] ss:$12 sps:$4 sm:$0xff]  }
   0xb   :  { %930 = vmatpush3.bf16.msra.mxu0 %v1060_v5  ;;  %1014 = vmatpush3.bf16.msra.mxu1 %v1075_v15  ;;  %v1100_v28 = vld [vmem:[%s1418_s0 + $0x98] ss:$12 sps:$4 sm:$0xff]   ;;  %v1101_v30 = vld [vmem:[%s1418_s0 + $0xb0] ss:$12 sps:$4 sm:$0xff]   ;;  %v1091_v35 = vld [vmem:[%s1418_s0 + $0x60] ss:$12 sps:$4 sm:$0xff]  }
   0xc   :  { %931 = vmatprep.subr.bf16.mxu0 %v1061_v6  ;;  %v1083_v31 = vld [vmem:[%s1418_s0 + $0x30] ss:$12 sps:$4 sm:$0xff]   ;;  %v1086_v32 = vld [vmem:[%s1418_s0 + $0x4c] ss:$12 sps:$4 sm:$0xff]   ;;  %v1097_v38 = vld [vmem:[%s1418_s0 + $0x94] ss:$12 sps:$4 sm:$0xff]  }
   0xd   :  { %v1089_v34 = vld [vmem:[%s1418_s0 + $0x64] ss:$12 sps:$4 sm:$0xff]   ;;  %v1094_v36 = vld [vmem:[%s1418_s0 + $0x7c] ss:$12 sps:$4 sm:$0xff]   ;;  %v1102_v40 = vld [vmem:[%s1418_s0 + $0xac] ss:$12 sps:$4 sm:$0xff]  }
   0xe   :  { %1016 = vmatmul.mubr.msk.bf16.vlgmr.msra.gmra.mrb[0].mxu1 %vm324_vm0, %v1077_v17  ;;  %v1096_v37 = vld [vmem:[%s1418_s0 + $0x78] ss:$12 sps:$4 sm:$0xff]   ;;  %v1099_v39 = vld [vmem:[%s1418_s0 + $0x90] ss:$12 sps:$4 sm:$0xff]   ;;  %v1104_v41 = vld [vmem:[%s1418_s0 + $0xa8] ss:$12 sps:$4 sm:$0xff]  }
   0xf   :  { %932 = vmatpush3.bf16.msra.mxu0 %v1062_v7  ;;  %1019 = vmatprep.mubr.msk.bf16.mxu1 %vm324_vm0, %v1084_v20  ;;  %v1105_v42 = vld [vmem:[%s1419_s3] sm:$0xff]   ;;  %v1106_v43 = vld [vmem:[%s1419_s3 + $0x8] sm:$0xff]   ;;  %v1107_v44 = vld [vmem:[%s1419_s3 + $0x10] sm:$0xff]  }
  0x10   :  { %933 = vmatprep.subr.bf16.mxu0 %v1063_v8  ;;  %1031 = vmatprep.subr.bf16.mxu1 %v1105_v42  ;;  %v1108_v45 = vld [vmem:[%s1419_s3 + $0x18] sm:$0xff]   ;;  %v1288_v54 = vld [vmem:[%s1420_s2] ss:$0 sm:$0xff] }
  0x11   :  { %1032 = vmatpush3.bf16.msra.mxu1 %v1105_v42 }
  0x12   :  { %1033 = vmatprep.subr.bf16.mxu1 %v1106_v43 }
  0x13   :  { %934 = vmatpush3.bf16.msra.mxu0 %v1064_v9 }
  0x14   :  { %935 = vmatprep.subr.bf16.mxu0 %v1065_v11 }
  0x15   :  { %1034 = vmatpush3.bf16.msra.mxu1 %v1106_v43 }
  0x16   :  { %1020 = vmatmul.mubr.msk.bf16.gmra.mrb[4].mxu1 %vm324_vm0, %v1085_v23  ;;  %1035 = vmatprep.subr.bf16.mxu1 %v1107_v44 }
  0x17   :  { %936 = vmatpush3.bf16.msra.mxu0 %v1066_v12  ;;  %1023 = vmatprep.mubr.msk.bf16.mxu1 %vm324_vm0, %v1092_v24 }
  0x18   :  { %937 = vmatprep.subr.bf16.mxu0 %v1067_v13 }
  0x19   :  { %1036 = vmatpush3.bf16.msra.mxu1 %v1107_v44 }
  0x1a   :  { %1037 = vmatprep.subr.bf16.mxu1 %v1108_v45 }
  0x1b   :  { %938 = vmatpush3.bf16.msra.mxu0 %v1068_v18 }
  0x1c   :  { %939 = vmatprep.subr.bf16.mxu0 %v1069_v19 }
  0x1d   :  { %1038 = vmatpush3.bf16.msra.mxu1 %v1108_v45 }
  0x1e   :  { %1024 = vmatmul.mubr.msk.bf16.gmra.mrb[8].mxu1 %vm324_vm0, %v1093_v26 }
  0x1f   :  { %940 = vmatpush3.bf16.msra.mxu0 %v1071_v21  ;;  %1027 = vmatprep.mubr.msk.bf16.mxu1 %vm324_vm0, %v1100_v28 }
  0x22   :  { %382 = vmatmul.mubr.bf16.vlgmr.msra.gmra.mrb[0].mxu0 %v1072_v22 }
  0x23   :  { %389 = vmatprep.mubr.bf16.mxu0 %v1078_v25 }
  0x26   :  { %1028 = vmatmul.mubr.msk.bf16.gmra.mrb[12].mxu1 %vm324_vm0, %v1101_v30 }
  0x2a   :  { %390 = vmatmul.mubr.bf16.gmra.mrb[4].mxu0 %v1080_v27 }
  0x2b   :  { %397 = vmatprep.mubr.bf16.mxu0 %v1081_v29 }
  0x32   :  { %398 = vmatmul.mubr.bf16.gmra.mrb[8].mxu0 %v1083_v31 }
  0x33   :  { %405 = vmatprep.mubr.bf16.mxu0 %v1086_v32 }
  0x3a   :  { %406 = vmatmul.mubr.bf16.gmra.mrb[12].mxu0 %v1088_v33 }
  0x3b   :  { %413 = vmatprep.mubr.bf16.mxu0 %v1089_v34 }
  0x42   :  { %414 = vmatmul.mubr.bf16.gmra.mrb[16].mxu0 %v1091_v35 }
  0x43   :  { %421 = vmatprep.mubr.bf16.mxu0 %v1094_v36 }
  0x4a   :  { %422 = vmatmul.mubr.bf16.gmra.mrb[20].mxu0 %v1096_v37 }
  0x4b   :  { %429 = vmatprep.mubr.bf16.mxu0 %v1097_v38 }
  0x52   :  { %430 = vmatmul.mubr.bf16.gmra.mrb[24].mxu0 %v1099_v39 }
  0x53   :  { %437 = vmatprep.mubr.bf16.mxu0 %v1102_v40 }
  0x5a   :  { %438 = vmatmul.mubr.bf16.gmra.mrb[28].mxu0 %v1104_v41 }
  0xe1   :  { %v1017_v46 = vpop.f32.mrb[0].mxu1 }
  0xe2   :  { %v480_v47 = vpop.f32.mrb[1].mxu1 }
  0xe3   :  { %v1018_v48 = vpop.f32.mrb[2].mxu1 }
  0xe4   :  { %v483_v49 = vpop.f32.mrb[3].mxu1 }
  0xe9   :  { %v1021_v50 = vpop.f32.mrb[4].mxu1 }
  0xea   :  { %v496_v52 = vpop.f32.mrb[5].mxu1 }
  0xeb   :  { %v1022_v55 = vpop.f32.mrb[6].mxu1 }
  0xec   :  { %v499_v58 = vpop.f32.mrb[7].mxu1 }
  0xf1   :  { %v1292_v0 = vpop.f32.mrb[8].mxu1 }
  0xf2   :  { %v512_v3 = vpop.f32.mrb[9].mxu1 }
  0xf3   :  { %v1294_v5 = vpop.f32.mrb[10].mxu1 }
  0xf4   :  { %v515_v10 = vpop.f32.mrb[11].mxu1 }
  0xf5   :  { %v941_v51 = vpop.f32.mrb[0].mxu0 }
  0xf6   :  { %v942_v53 = vpop.f32.mrb[1].mxu0 }
  0xf7   :  { %v943_v56 = vadd.f32 %v942_v53, %v941_v51  ;;  %v944_v57 = vpop.f32.mrb[2].mxu0 }
  0xf8   :  { %v945_v59 = vpop.f32.mrb[3].mxu0 }
  0xf9   :  { %v946_v60 = vadd.f32 %v945_v59, %v944_v57  ;;  %v384_v61 = vadd.f32 %v943_v56, %v1288_v54  ;;  %v1299_v17 = vpop.f32.mrb[12].mxu1 }
  0xfa   :  { %v1301_v20 = vpop.f32.mrb[13].mxu1 }
  0xfb   :  { %v481_v62 = vadd.f32 %v480_v47, %v384_v61  ;;  %v387_v63 = vadd.f32 %v946_v60, %v1288_v54  ;;  %v1303_v22 = vpop.f32.mrb[14].mxu1 }
  0xfc   :  { %v1305_v27 = vpop.f32.mrb[15].mxu1 }
  0xfd   :  { %v484_v1 = vadd.f32 %v483_v49, %v387_v63  ;;  %v947_v2 = vpop.f32.mrb[4].mxu0  ;;  %v543_v6 = vmax.f32 %v481_v62, 0.0 }
  0xfe   :  { %v948_v4 = vpop.f32.mrb[5].mxu0 }
  0xff   :  { %v544_v7 = vmax.f32 %v484_v1, 0.0  ;;  %v949_v8 = vadd.f32 %v948_v4, %v947_v2  ;;  %v950_v9 = vpop.f32.mrb[6].mxu0 }
 0x100   :  { %v951_v11 = vpop.f32.mrb[7].mxu0 }
 0x101   :  { %v559_v12 = vpack.c.bf16 %v544_v7, %v543_v6  ;;  %v392_v13 = vadd.f32 %v949_v8, %v1288_v54  ;;  %v952_v14 = vadd.f32 %v951_v11, %v950_v9 }
 0x103   :  { %v489_v15 = vadd.f32 %v1017_v46, %v392_v13  ;;  %v395_v16 = vadd.f32 %v952_v14, %v1288_v54  ;;  %1039 = vmatprep.mubr.msk.bf16.mxu1 %vm606_vm1, %v559_v12 }
 0x105   :  { %v492_v18 = vadd.f32 %v1018_v48, %v395_v16  ;;  %v953_v19 = vpop.f32.mrb[8].mxu0  ;;  %v545_v23 = vmax.f32 %v489_v15, 0.0 }
 0x106   :  { %v954_v21 = vpop.f32.mrb[9].mxu0 }
 0x107   :  { %v546_v24 = vmax.f32 %v492_v18, 0.0  ;;  %v955_v25 = vadd.f32 %v954_v21, %v953_v19  ;;  %v956_v26 = vpop.f32.mrb[10].mxu0 }
 0x108   :  { %v957_v28 = vpop.f32.mrb[11].mxu0 }
 0x109   :  { %v560_v29 = vpack.c.bf16 %v546_v24, %v545_v23  ;;  %v958_v30 = vadd.f32 %v957_v28, %v956_v26  ;;  %v400_v31 = vadd.f32 %v955_v25, %v1288_v54 }
 0x10b   :  { %v497_v32 = vadd.f32 %v496_v52, %v400_v31  ;;  %1040 = vmatmul.mubr.msk.bf16.vlgmr.msra.gmra.mrb[16].mxu1 %vm606_vm1, %v560_v29  ;;  %v403_v33 = vadd.f32 %v958_v30, %v1288_v54 }
 0x10d   :  { %v500_v34 = vadd.f32 %v499_v58, %v403_v33  ;;  %v959_v35 = vpop.f32.mrb[12].mxu0  ;;  %v547_v37 = vmax.f32 %v497_v32, 0.0 }
 0x10e   :  { %v960_v36 = vpop.f32.mrb[13].mxu0 }
 0x10f   :  { %v548_v38 = vmax.f32 %v500_v34, 0.0  ;;  %v961_v39 = vadd.f32 %v960_v36, %v959_v35  ;;  %v962_v40 = vpop.f32.mrb[14].mxu0 }
 0x110   :  { %v963_v41 = vpop.f32.mrb[15].mxu0 }
 0x111   :  { %v561_v42 = vpack.c.bf16 %v548_v38, %v547_v37  ;;  %v408_v43 = vadd.f32 %v961_v39, %v1288_v54  ;;  %v964_v44 = vadd.f32 %v963_v41, %v962_v40 }
 0x113   :  { %v505_v45 = vadd.f32 %v1021_v50, %v408_v43  ;;  %v411_v46 = vadd.f32 %v964_v44, %v1288_v54  ;;  %1043 = vmatprep.mubr.msk.bf16.mxu1 %vm606_vm1, %v561_v42  ;;  %v1335_v42 = vld [vmem:[%s1421_s4] ss:$0 sm:$0xff] }
 0x115   :  { %v508_v47 = vadd.f32 %v1022_v55, %v411_v46  ;;  %v965_v48 = vpop.f32.mrb[16].mxu0  ;;  %v549_v51 = vmax.f32 %v505_v45, 0.0 }
 0x116   :  { %v966_v49 = vpop.f32.mrb[17].mxu0 }
 0x117   :  { %v550_v52 = vmax.f32 %v508_v47, 0.0  ;;  %v967_v53 = vadd.f32 %v966_v49, %v965_v48  ;;  %v968_v56 = vpop.f32.mrb[18].mxu0 }
 0x118   :  { %v969_v57 = vpop.f32.mrb[19].mxu0 }
 0x119   :  { %v562_v58 = vpack.c.bf16 %v550_v52, %v549_v51  ;;  %v970_v59 = vadd.f32 %v969_v57, %v968_v56  ;;  %v416_v60 = vadd.f32 %v967_v53, %v1288_v54 }
 0x11b   :  { %v513_v61 = vadd.f32 %v512_v3, %v416_v60  ;;  %1044 = vmatmul.mubr.msk.bf16.gmra.mrb[20].mxu1 %vm606_vm1, %v562_v58  ;;  %v419_v50 = vadd.f32 %v970_v59, %v1288_v54 }
 0x11d   :  { %v516_v62 = vadd.f32 %v515_v10, %v419_v50  ;;  %v971_v63 = vpop.f32.mrb[20].mxu0  ;;  %v551_v55 = vmax.f32 %v513_v61, 0.0 }
 0x11e   :  { %v972_v1 = vpop.f32.mrb[21].mxu0 }
 0x11f   :  { %v552_v2 = vmax.f32 %v516_v62, 0.0  ;;  %v973_v4 = vadd.f32 %v972_v1, %v971_v63  ;;  %v974_v6 = vpop.f32.mrb[22].mxu0 }
 0x120   :  { %v975_v7 = vpop.f32.mrb[23].mxu0 }
 0x121   :  { %v563_v8 = vpack.c.bf16 %v552_v2, %v551_v55  ;;  %v424_v9 = vadd.f32 %v973_v4, %v1288_v54  ;;  %v976_v11 = vadd.f32 %v975_v7, %v974_v6 }
 0x123   :  { %v521_v12 = vadd.f32 %v1292_v0, %v424_v9  ;;  %v427_v3 = vadd.f32 %v976_v11, %v1288_v54  ;;  %1047 = vmatprep.mubr.msk.bf16.mxu1 %vm606_vm1, %v563_v8 }
 0x125   :  { %v524_v13 = vadd.f32 %v1294_v5, %v427_v3  ;;  %v977_v10 = vpop.f32.mrb[24].mxu0  ;;  %v553_v15 = vmax.f32 %v521_v12, 0.0 }
 0x126   :  { %v978_v14 = vpop.f32.mrb[25].mxu0 }
 0x127   :  { %v554_v16 = vmax.f32 %v524_v13, 0.0  ;;  %v979_v18 = vadd.f32 %v978_v14, %v977_v10  ;;  %v980_v19 = vpop.f32.mrb[26].mxu0 }
 0x128   :  { %v981_v21 = vpop.f32.mrb[27].mxu0 }
 0x129   :  { %v564_v23 = vpack.c.bf16 %v554_v16, %v553_v15  ;;  %v982_v24 = vadd.f32 %v981_v21, %v980_v19  ;;  %v432_v25 = vadd.f32 %v979_v18, %v1288_v54 }
 0x12b   :  { %v529_v26 = vadd.f32 %v1301_v20, %v432_v25  ;;  %1048 = vmatmul.mubr.msk.bf16.gmra.mrb[24].mxu1 %vm606_vm1, %v564_v23  ;;  %v435_v0 = vadd.f32 %v982_v24, %v1288_v54 }
 0x12d   :  { %v532_v28 = vadd.f32 %v1305_v27, %v435_v0  ;;  %v983_v5 = vpop.f32.mrb[28].mxu0  ;;  %v555_v30 = vmax.f32 %v529_v26, 0.0 }
 0x12e   :  { %v984_v29 = vpop.f32.mrb[29].mxu0 }
 0x12f   :  { %v556_v31 = vmax.f32 %v532_v28, 0.0  ;;  %v985_v32 = vadd.f32 %v984_v29, %v983_v5  ;;  %v986_v33 = vpop.f32.mrb[30].mxu0 }
 0x130   :  { %v987_v34 = vpop.f32.mrb[31].mxu0 }
 0x131   :  { %v565_v35 = vpack.c.bf16 %v556_v31, %v555_v30  ;;  %v440_v36 = vadd.f32 %v985_v32, %v1288_v54  ;;  %v988_v37 = vadd.f32 %v987_v34, %v986_v33 }
 0x133   :  { %v537_v38 = vadd.f32 %v1299_v17, %v440_v36  ;;  %v443_v20 = vadd.f32 %v988_v37, %v1288_v54  ;;  %1051 = vmatprep.mubr.msk.bf16.mxu1 %vm606_vm1, %v565_v35 }
 0x135   :  { %v540_v39 = vadd.f32 %v1303_v22, %v443_v20  ;;  %v557_v27 = vmax.f32 %v537_v38, 0.0 }
 0x137   :  { %v558_v40 = vmax.f32 %v540_v39, 0.0 }
 0x139   :  { %v566_v41 = vpack.c.bf16 %v558_v40, %v557_v27 }
 0x13b   :  { %1052 = vmatmul.mubr.msk.bf16.gmra.mrb[28].mxu1 %vm606_vm1, %v566_v41 }
 0x1de   :  { %v1041_v43 = vpop.f32.mrb[16].mxu1 }
 0x1df   :  { %v674_v44 = vadd.f32 %v1041_v43, %v1335_v42  ;;  %v665_v17 = vpop.f32.mrb[17].mxu1 }
 0x1e0   :  { %v666_v54 = vadd.f32 %v1335_v42, %v665_v17  ;;  %v1042_v45 = vpop.f32.mrb[18].mxu1 }
 0x1e1   :  { %v730_v46 = vmax.f32 %v674_v44, 0.0  ;;  %v677_v22 = vadd.f32 %v1042_v45, %v1335_v42  ;;  %v668_v47 = vpop.f32.mrb[19].mxu1 }
 0x1e2   :  { %v728_v48 = vmax.f32 %v666_v54, 0.0  ;;  %v669_v49 = vadd.f32 %v1335_v42, %v668_v47 }
 0x1e3   :  { %v911_v51 = vpack.c.bf16 %v730_v46, %v730_v46  ;;  %v731_v52 = vmax.f32 %v677_v22, 0.0 }
 0x1e4   :  { %v909_v53 = vpack.c.bf16 %v728_v48, %v728_v48  ;;  %v729_v56 = vmax.f32 %v669_v49, 0.0 }
 0x1e5   :  { %811 = vst.msk [vmem:[%s1422_s5 + $0x8] sm:$0xf] %vm808_vm2, %v911_v51  ;;  %v912_v57 = vpack.c.bf16 %v731_v52, %v731_v52 }
 0x1e6   :  { %809 = vst.msk [vmem:[%s1422_s5] sm:$0xf] %vm808_vm2, %v909_v53  ;;  %v910_v58 = vpack.c.bf16 %v729_v56, %v729_v56 }
 0x1e7   :  { %812 = vst.msk [vmem:[%s1422_s5 + $0xc] sm:$0xf] %vm808_vm2, %v912_v57 }
 0x1e8   :  { %810 = vst.msk [vmem:[%s1422_s5 + $0x4] sm:$0xf] %vm808_vm2, %v910_v58 }
 0x1ee   :  { %v1045_v59 = vpop.f32.mrb[20].mxu1 }
 0x1ef   :  { %v690_v60 = vadd.f32 %v1045_v59, %v1335_v42  ;;  %v681_v61 = vpop.f32.mrb[21].mxu1 }
 0x1f0   :  { %v682_v50 = vadd.f32 %v1335_v42, %v681_v61  ;;  %v1046_v62 = vpop.f32.mrb[22].mxu1 }
 0x1f1   :  { %v734_v63 = vmax.f32 %v690_v60, 0.0  ;;  %v693_v1 = vadd.f32 %v1046_v62, %v1335_v42  ;;  %v684_v55 = vpop.f32.mrb[23].mxu1 }
 0x1f2   :  { %v732_v2 = vmax.f32 %v682_v50, 0.0  ;;  %v685_v4 = vadd.f32 %v1335_v42, %v684_v55 }
 0x1f3   :  { %v915_v6 = vpack.c.bf16 %v734_v63, %v734_v63  ;;  %v735_v7 = vmax.f32 %v693_v1, 0.0 }
 0x1f4   :  { %v913_v8 = vpack.c.bf16 %v732_v2, %v732_v2  ;;  %v733_v9 = vmax.f32 %v685_v4, 0.0 }
 0x1f5   :  { %815 = vst.msk [vmem:[%s1422_s5 + $0x18] sm:$0xf] %vm808_vm2, %v915_v6  ;;  %v916_v11 = vpack.c.bf16 %v735_v7, %v735_v7 }
 0x1f6   :  { %813 = vst.msk [vmem:[%s1422_s5 + $0x10] sm:$0xf] %vm808_vm2, %v913_v8  ;;  %v914_v12 = vpack.c.bf16 %v733_v9, %v733_v9 }
 0x1f7   :  { %816 = vst.msk [vmem:[%s1422_s5 + $0x1c] sm:$0xf] %vm808_vm2, %v916_v11 }
 0x1f8   :  { %814 = vst.msk [vmem:[%s1422_s5 + $0x14] sm:$0xf] %vm808_vm2, %v914_v12 }
 0x1fe   :  { %v1049_v3 = vpop.f32.mrb[24].mxu1 }
 0x1ff   :  { %v706_v13 = vadd.f32 %v1049_v3, %v1335_v42  ;;  %v697_v10 = vpop.f32.mrb[25].mxu1 }
 0x200   :  { %v698_v14 = vadd.f32 %v1335_v42, %v697_v10  ;;  %v1050_v15 = vpop.f32.mrb[26].mxu1 }
 0x201   :  { %v738_v16 = vmax.f32 %v706_v13, 0.0  ;;  %v709_v18 = vadd.f32 %v1050_v15, %v1335_v42  ;;  %v700_v19 = vpop.f32.mrb[27].mxu1 }
 0x202   :  { %v736_v21 = vmax.f32 %v698_v14, 0.0  ;;  %v701_v23 = vadd.f32 %v1335_v42, %v700_v19 }
 0x203   :  { %v919_v24 = vpack.c.bf16 %v738_v16, %v738_v16  ;;  %v739_v25 = vmax.f32 %v709_v18, 0.0 }
 0x204   :  { %v917_v26 = vpack.c.bf16 %v736_v21, %v736_v21  ;;  %v737_v0 = vmax.f32 %v701_v23, 0.0 }
 0x205   :  { %819 = vst.msk [vmem:[%s1422_s5 + $0x28] sm:$0xf] %vm808_vm2, %v919_v24  ;;  %v920_v28 = vpack.c.bf16 %v739_v25, %v739_v25 }
 0x206   :  { %817 = vst.msk [vmem:[%s1422_s5 + $0x20] sm:$0xf] %vm808_vm2, %v917_v26  ;;  %v918_v5 = vpack.c.bf16 %v737_v0, %v737_v0 }
 0x207   :  { %820 = vst.msk [vmem:[%s1422_s5 + $0x2c] sm:$0xf] %vm808_vm2, %v920_v28 }
 0x208   :  { %818 = vst.msk [vmem:[%s1422_s5 + $0x24] sm:$0xf] %vm808_vm2, %v918_v5 }
 0x20e   :  { %v1053_v29 = vpop.f32.mrb[28].mxu1 }
 0x20f   :  { %v722_v30 = vadd.f32 %v1053_v29, %v1335_v42  ;;  %v713_v31 = vpop.f32.mrb[29].mxu1 }
 0x210   :  { %v714_v32 = vadd.f32 %v1335_v42, %v713_v31  ;;  %v1054_v33 = vpop.f32.mrb[30].mxu1 }
 0x211   :  { %v742_v34 = vmax.f32 %v722_v30, 0.0  ;;  %v725_v35 = vadd.f32 %v1054_v33, %v1335_v42  ;;  %v716_v36 = vpop.f32.mrb[31].mxu1 }
 0x212   :  { %v740_v37 = vmax.f32 %v714_v32, 0.0  ;;  %v717_v38 = vadd.f32 %v1335_v42, %v716_v36 }
 0x213   :  { %v923_v20 = vpack.c.bf16 %v742_v34, %v742_v34  ;;  %v743_v39 = vmax.f32 %v725_v35, 0.0 }
 0x214   :  { %v921_v27 = vpack.c.bf16 %v740_v37, %v740_v37  ;;  %v741_v40 = vmax.f32 %v717_v38, 0.0 }
 0x215   :  { %823 = vst.msk [vmem:[%s1422_s5 + $0x38] sm:$0xf] %vm808_vm2, %v923_v20  ;;  %v924_v41 = vpack.c.bf16 %v743_v39, %v743_v39 }
 0x216   :  { %821 = vst.msk [vmem:[%s1422_s5 + $0x30] sm:$0xf] %vm808_vm2, %v921_v27  ;;  %v922_v43 = vpack.c.bf16 %v741_v40, %v741_v40 }
 0x217   :  { %824 = vst.msk [vmem:[%s1422_s5 + $0x3c] sm:$0xf] %vm808_vm2, %v924_v41 }
 0x218   :  { %822 = vst.msk [vmem:[%s1422_s5 + $0x34] sm:$0xf] %vm808_vm2, %v922_v43 }

// kernel: backbone_mtf_msf_forward.5
= control target key start
LH: loop header
LB: loop body
LE: loop exit
PB: predicated region body
PF: predicated region fallthrough
CT: control target
= control target key end

     0   :  { %s1042_s15 = smov 0   ;;  %s1267_s0 = inlined_call_operand.vmem [shape: bf16[512,32], index: 0, kind: input, shape index: {}]   ;;  %s1268_s1 = inlined_call_operand.vmem [shape: bf16[32,16], index: 1, kind: input, shape index: {}]   ;;  %s1269_s2 = inlined_call_operand.vmem [shape: f32[1,16], index: 2, kind: input, shape index: {}]   ;;  %s1270_s3 = inlined_call_operand.vmem [shape: bf16[512,16], index: 3, kind: input, shape index: {}]   ;;  %s1271_s4 = inlined_call_operand.vmem [shape: f32[512,16], index: 4, kind: output, shape index: {}]  }
   0x1 LB: > { %s798_s16 = sadd.s32 4294967295, %s1015_s15   ;;  %p802_p0 = scmp.ge.s32.totalorder %s1015_s15, 1  ;;  %s1015_s15 = sphi %s1042_s15, %s14_s15  }
   0x2   : > { %p174_p1 = scmp.lt.s32.totalorder %s1015_s15, 3 }
   0x4   : > { %p175_p2 = pnand %p802_p0, %p174_p1 }
   0x5   : > { %v991_v0 = vld [vmem:[%s1268_s1] sm:$0xff] (!%p175_p2)   ;;  %s803_s19 = sshll.u32 (!%p175_p2), %s798_s16, 5  ;;  %v992_v1 = vld [vmem:[%s1268_s1 + $0x8] sm:$0xff] (!%p175_p2)   ;;  %vm359_vm0 = vcmask (!%p175_p2), 261120   ;;  %vm697_vm1 = vcmask (!%p175_p2), 130048  }
   0x6   : > { %178 = sbr.rel (%p175_p2) target bundleno = 265 (0x109), region = 36  ;;  %p206_p3 = scmp.lt.s32.totalorder (!%p175_p2), %s803_s19, 63  ;;  %943 = vmatprep.subr.bf16.mxu0 (!%p175_p2), %v991_v0  ;;  %979 = vmatprep.subr.bf16.mxu1 (!%p175_p2), %v991_v0  ;;  %v1110_v20 = vld [vmem:[%s1269_s2] ss:$0 sm:$0xff] (!%p175_p2) }
   0x7   : > { %944 = vmatpush3.bf16.msra.mxu0 (!%p175_p2), %v991_v0  ;;  %981 = vmatpush3.bf16.msra.mxu1 (!%p175_p2), %v991_v0 }
   0x8   : > { %945 = vmatprep.subr.bf16.mxu0 (!%p175_p2), %v992_v1  ;;  %980 = vmatprep.subr.bf16.mxu1 (!%p175_p2), %v992_v1 }
   0xb   : > { %946 = vmatpush3.bf16.msra.mxu0 (!%p175_p2), %v992_v1  ;;  %982 = vmatpush3.bf16.msra.mxu1 (!%p175_p2), %v992_v1 }
   0xd   : > { %s1273_s19 = smov (!%p206_p3, %s803_s19), 63 }
   0xe   : > { %s804_s22 = sshll.u32 %s1273_s19, 2  ;;  %s808_s5 = sshll.u32 %s1273_s19, 3 }
   0xf   : > { %s1064_s25 = scalar_lea.vmem %s1267_s0, %s804_s22  ;;  %s1103_s28 = scalar_lea.vmem %s1270_s3, %s804_s22 }
  0x10   : > { %v993_v2 = vld [vmem:[%s1064_s25] sm:$0xff]   ;;  %v995_v4 = vld [vmem:[%s1064_s25 + $0x8] sm:$0xff]   ;;  %v997_v6 = vld [vmem:[%s1064_s25 + $0x10] sm:$0xff]   ;;  %s1123_s8 = scalar_lea.vmem %s1271_s4, %s808_s5 }
  0x11   : > { %v994_v3 = vld [vmem:[%s1064_s25 + $0x40] sm:$0xff]   ;;  %947 = vmatprep.mubr.msk.bf16.mxu0 %vm359_vm0, %v993_v2  ;;  %v996_v5 = vld [vmem:[%s1064_s25 + $0x48] sm:$0xff]   ;;  %v998_v7 = vld [vmem:[%s1064_s25 + $0x50] sm:$0xff]  }
  0x12   : > { %963 = vmatprep.mubr.msk.bf16.mxu1 %vm359_vm0, %v994_v3  ;;  %948 = vmatmul.mubr.msk.bf16.vlgmr.msra.gmra.mrb[0].mxu0 %vm359_vm0, %v995_v4  ;;  %v999_v8 = vld [vmem:[%s1064_s25 + $0x18] sm:$0xff]   ;;  %v1001_v10 = vld [vmem:[%s1064_s25 + $0x20] sm:$0xff]   ;;  %v1003_v12 = vld [vmem:[%s1064_s25 + $0x28] sm:$0xff]  }
  0x13   : > { %964 = vmatmul.mubr.msk.bf16.vlgmr.msra.gmra.mrb[0].mxu1 %vm359_vm0, %v996_v5  ;;  %951 = vmatprep.mubr.msk.bf16.mxu0 %vm359_vm0, %v997_v6  ;;  %v1000_v9 = vld [vmem:[%s1064_s25 + $0x58] sm:$0xff]   ;;  %v1002_v11 = vld [vmem:[%s1064_s25 + $0x60] sm:$0xff]   ;;  %v1004_v13 = vld [vmem:[%s1064_s25 + $0x68] sm:$0xff]  }
  0x14   : > { %967 = vmatprep.mubr.msk.bf16.mxu1 %vm359_vm0, %v998_v7  ;;  %v1005_v14 = vld [vmem:[%s1064_s25 + $0x30] sm:$0xff]   ;;  %v1007_v16 = vld [vmem:[%s1064_s25 + $0x38] sm:$0xff]   ;;  %v910_v18 = vld [vmem:[%s1103_s28 + $0x8] sm:$0xff]  }
  0x15   : > { %v1006_v15 = vld [vmem:[%s1064_s25 + $0x70] sm:$0xff]   ;;  %v1008_v17 = vld [vmem:[%s1064_s25 + $0x78] sm:$0xff]   ;;  %v918_v19 = vld [vmem:[%s1103_s28 + $0x48] sm:$0xff]   ;;  %v852_v24 = vunpack.c.l.bf16 %v910_v18  ;;  %v853_v31 = vunpack.c.h.bf16 %v910_v18 }
  0x16   : > { %v847_v21 = vld [vmem:[%s1103_s28] sm:$0xff]   ;;  %v884_v25 = vunpack.c.l.bf16 %v918_v19  ;;  %v885_v36 = vunpack.c.h.bf16 %v918_v19  ;;  %v1128_v49 = vld [vmem:[%s1103_s28 + $0x18] sm:$0xff]   ;;  %v1135_v55 = vld [vmem:[%s1103_s28 + $0x10] sm:$0xff]  }
  0x17   : > { %v917_v22 = vld [vmem:[%s1103_s28 + $0x40] sm:$0xff]   ;;  %v848_v29 = vunpack.c.l.bf16 %v847_v21  ;;  %v849_v37 = vunpack.c.h.bf16 %v847_v21  ;;  %v1132_v54 = vld [vmem:[%s1103_s28 + $0x58] sm:$0xff]   ;;  %v1138_v60 = vld [vmem:[%s1103_s28 + $0x50] sm:$0xff]   ;;  %v860_v0 = vunpack.c.l.bf16 %v1128_v49  ;;  %v856_v5 = vunpack.c.l.bf16 %v1135_v55 }
  0x18   : > { %v880_v30 = vunpack.c.l.bf16 %v917_v22  ;;  %v881_v43 = vunpack.c.h.bf16 %v917_v22  ;;  %v892_v4 = vunpack.c.l.bf16 %v1132_v54 }
  0x1a   : > { %952 = vmatmul.mubr.msk.bf16.gmra.mrb[4].mxu0 %vm359_vm0, %v999_v8 }
  0x1b   : > { %968 = vmatmul.mubr.msk.bf16.gmra.mrb[4].mxu1 %vm359_vm0, %v1000_v9  ;;  %955 = vmatprep.mubr.msk.bf16.mxu0 %vm359_vm0, %v1001_v10  ;;  %v888_v10 = vunpack.c.l.bf16 %v1138_v60 }
  0x1c   : > { %971 = vmatprep.mubr.msk.bf16.mxu1 %vm359_vm0, %v1002_v11  ;;  %v861_v11 = vunpack.c.h.bf16 %v1128_v49 }
  0x22   : > { %956 = vmatmul.mubr.msk.bf16.gmra.mrb[8].mxu0 %vm359_vm0, %v1003_v12 }
  0x23   : > { %972 = vmatmul.mubr.msk.bf16.gmra.mrb[8].mxu1 %vm359_vm0, %v1004_v13  ;;  %959 = vmatprep.mubr.msk.bf16.mxu0 %vm359_vm0, %v1005_v14 }
  0x24   : > { %975 = vmatprep.mubr.msk.bf16.mxu1 %vm359_vm0, %v1006_v15 }
  0x2a   : > { %960 = vmatmul.mubr.msk.bf16.gmra.mrb[12].mxu0 %vm359_vm0, %v1007_v16  ;;  %v893_v16 = vunpack.c.h.bf16 %v1132_v54 }
  0x2b   : > { %976 = vmatmul.mubr.msk.bf16.gmra.mrb[12].mxu1 %vm359_vm0, %v1008_v17  ;;  %v857_v17 = vunpack.c.h.bf16 %v1135_v55 }
  0xe5   : > { %v949_v23 = vpop.f32.mrb[0].mxu0 }
  0xe6   : > { %v451_v26 = vadd.f32 %v949_v23, %v1110_v20  ;;  %v965_v27 = vpop.f32.mrb[0].mxu1  ;;  %v442_v28 = vpop.f32.mrb[1].mxu0 }
  0xe7   : > { %v515_v32 = vadd.f32 %v965_v27, %v1110_v20  ;;  %v443_v33 = vadd.f32 %v1110_v20, %v442_v28  ;;  %v506_v34 = vpop.f32.mrb[1].mxu1  ;;  %v950_v35 = vpop.f32.mrb[2].mxu0 }
  0xe8   : > { %v571_v38 = vmax.f32 %v451_v26, 0.0  ;;  %v507_v39 = vadd.f32 %v1110_v20, %v506_v34  ;;  %v454_v40 = vadd.f32 %v950_v35, %v1110_v20  ;;  %v966_v41 = vpop.f32.mrb[2].mxu1  ;;  %v445_v42 = vpop.f32.mrb[3].mxu0  ;;  %v1176_v35 = vld [vmem:[%s1103_s28 + $0x68] sm:$0xff]  }
  0xe9   : > { %v587_v44 = vmax.f32 %v515_v32, 0.0  ;;  %v569_v45 = vmax.f32 %v443_v33, 0.0  ;;  %v518_v46 = vadd.f32 %v966_v41, %v1110_v20  ;;  %v446_v47 = vadd.f32 %v1110_v20, %v445_v42  ;;  %v509_v48 = vpop.f32.mrb[3].mxu1  ;;  %v1182_v41 = vld [vmem:[%s1103_s28 + $0x60] sm:$0xff]  }
  0xea   : > { %v667_v50 = vadd.f32 %v852_v24, %v571_v38  ;;  %v585_v51 = vmax.f32 %v507_v39, 0.0  ;;  %v572_v52 = vmax.f32 %v454_v40, 0.0  ;;  %v510_v53 = vadd.f32 %v1110_v20, %v509_v48 }
  0xeb   : > { %v683_v56 = vadd.f32 %v884_v25, %v587_v44  ;;  %v665_v57 = vadd.f32 %v848_v29, %v569_v45  ;;  %v588_v58 = vmax.f32 %v518_v46, 0.0  ;;  %v570_v59 = vmax.f32 %v446_v47, 0.0 }
  0xec   : > { %700 = vst.msk [vmem:[%s1123_s8 + $0x10] sm:$0xff] %vm697_vm1, %v667_v50  ;;  %v681_v61 = vadd.f32 %v880_v30, %v585_v51  ;;  %v668_v62 = vadd.f32 %v853_v31, %v572_v52  ;;  %v586_v63 = vmax.f32 %v510_v53, 0.0  ;;  %v889_v24 = vunpack.c.h.bf16 %v1138_v60  ;;  %v1172_v30 = vld [vmem:[%s1103_s28 + $0x28] sm:$0xff]  }
  0xed   : > { %716 = vst.msk [vmem:[%s1123_s8 + $0x90] sm:$0xff] %vm697_vm1, %v683_v56  ;;  %698 = vst.msk [vmem:[%s1123_s8] sm:$0xff] %vm697_vm1, %v665_v57  ;;  %v684_v1 = vadd.f32 %v885_v36, %v588_v58  ;;  %v666_v2 = vadd.f32 %v849_v37, %v570_v59  ;;  %v953_v3 = vpop.f32.mrb[4].mxu0  ;;  %v1179_v36 = vld [vmem:[%s1103_s28 + $0x20] sm:$0xff]   ;;  %v868_v45 = vunpack.c.l.bf16 %v1172_v30  ;;  %v900_v49 = vunpack.c.l.bf16 %v1176_v35 }
  0xee   : > { %714 = vst.msk [vmem:[%s1123_s8 + $0x80] sm:$0xff] %vm697_vm1, %v681_v61  ;;  %701 = vst.msk [vmem:[%s1123_s8 + $0x18] sm:$0xff] %vm697_vm1, %v668_v62  ;;  %v682_v6 = vadd.f32 %v881_v43, %v586_v63  ;;  %v467_v7 = vadd.f32 %v953_v3, %v1110_v20  ;;  %v969_v8 = vpop.f32.mrb[4].mxu1  ;;  %v458_v9 = vpop.f32.mrb[5].mxu0  ;;  %v864_v50 = vunpack.c.l.bf16 %v1179_v36  ;;  %v896_v55 = vunpack.c.l.bf16 %v1182_v41 }
  0xef   : > { %717 = vst.msk [vmem:[%s1123_s8 + $0x98] sm:$0xff] %vm697_vm1, %v684_v1  ;;  %699 = vst.msk [vmem:[%s1123_s8 + $0x8] sm:$0xff] %vm697_vm1, %v666_v2  ;;  %v531_v12 = vadd.f32 %v969_v8, %v1110_v20  ;;  %v459_v13 = vadd.f32 %v1110_v20, %v458_v9  ;;  %v522_v14 = vpop.f32.mrb[5].mxu1  ;;  %v954_v15 = vpop.f32.mrb[6].mxu0  ;;  %v869_v56 = vunpack.c.h.bf16 %v1172_v30  ;;  %v901_v61 = vunpack.c.h.bf16 %v1176_v35 }
  0xf0   : > { %715 = vst.msk [vmem:[%s1123_s8 + $0x88] sm:$0xff] %vm697_vm1, %v682_v6  ;;  %v575_v18 = vmax.f32 %v467_v7, 0.0  ;;  %v523_v19 = vadd.f32 %v1110_v20, %v522_v14  ;;  %v470_v21 = vadd.f32 %v954_v15, %v1110_v20  ;;  %v970_v22 = vpop.f32.mrb[6].mxu1  ;;  %v461_v23 = vpop.f32.mrb[7].mxu0  ;;  %v865_v62 = vunpack.c.h.bf16 %v1179_v36  ;;  %v924_v15 = vld [vmem:[%s1103_s28 + $0x78] sm:$0xff]  }
  0xf1   : > { %v591_v25 = vmax.f32 %v531_v12, 0.0  ;;  %v573_v26 = vmax.f32 %v459_v13, 0.0  ;;  %v534_v27 = vadd.f32 %v970_v22, %v1110_v20  ;;  %v462_v28 = vadd.f32 %v1110_v20, %v461_v23  ;;  %v525_v29 = vpop.f32.mrb[7].mxu1  ;;  %v923_v22 = vld [vmem:[%s1103_s28 + $0x70] sm:$0xff]  }
  0xf2   : > { %v671_v31 = vadd.f32 %v860_v0, %v575_v18  ;;  %v589_v32 = vmax.f32 %v523_v19, 0.0  ;;  %v576_v33 = vmax.f32 %v470_v21, 0.0  ;;  %v526_v34 = vadd.f32 %v1110_v20, %v525_v29 }
  0xf3   : > { %v687_v37 = vadd.f32 %v892_v4, %v591_v25  ;;  %v669_v38 = vadd.f32 %v856_v5, %v573_v26  ;;  %v592_v39 = vmax.f32 %v534_v27, 0.0  ;;  %v574_v40 = vmax.f32 %v462_v28, 0.0 }
  0xf4   : > { %704 = vst.msk [vmem:[%s1123_s8 + $0x30] sm:$0xff] %vm697_vm1, %v671_v31  ;;  %v685_v42 = vadd.f32 %v888_v10, %v589_v32  ;;  %v672_v43 = vadd.f32 %v861_v11, %v576_v33  ;;  %v590_v44 = vmax.f32 %v526_v34, 0.0  ;;  %v897_v4 = vunpack.c.h.bf16 %v1182_v41  ;;  %v1216_v10 = vld [vmem:[%s1103_s28 + $0x38] sm:$0xff]  }
  0xf5   : > { %720 = vst.msk [vmem:[%s1123_s8 + $0xb0] sm:$0xff] %vm697_vm1, %v687_v37  ;;  %702 = vst.msk [vmem:[%s1123_s8 + $0x20] sm:$0xff] %vm697_vm1, %v669_v38  ;;  %v688_v46 = vadd.f32 %v893_v16, %v592_v39  ;;  %v670_v47 = vadd.f32 %v857_v17, %v574_v40  ;;  %v957_v48 = vpop.f32.mrb[8].mxu0  ;;  %v915_v16 = vld [vmem:[%s1103_s28 + $0x30] sm:$0xff]   ;;  %v876_v26 = vunpack.c.l.bf16 %v1216_v10  ;;  %v908_v30 = vunpack.c.l.bf16 %v924_v15 }
  0xf6   : > { %718 = vst.msk [vmem:[%s1123_s8 + $0xa0] sm:$0xff] %vm697_vm1, %v685_v42  ;;  %705 = vst.msk [vmem:[%s1123_s8 + $0x38] sm:$0xff] %vm697_vm1, %v672_v43  ;;  %v686_v51 = vadd.f32 %v889_v24, %v590_v44  ;;  %v483_v52 = vadd.f32 %v957_v48, %v1110_v20  ;;  %v973_v53 = vpop.f32.mrb[8].mxu1  ;;  %v474_v54 = vpop.f32.mrb[9].mxu0  ;;  %v872_v31 = vunpack.c.l.bf16 %v915_v16  ;;  %v904_v36 = vunpack.c.l.bf16 %v923_v22 }
  0xf7   : > { %721 = vst.msk [vmem:[%s1123_s8 + $0xb8] sm:$0xff] %vm697_vm1, %v688_v46  ;;  %703 = vst.msk [vmem:[%s1123_s8 + $0x28] sm:$0xff] %vm697_vm1, %v670_v47  ;;  %v547_v57 = vadd.f32 %v973_v53, %v1110_v20  ;;  %v475_v58 = vadd.f32 %v1110_v20, %v474_v54  ;;  %v538_v59 = vpop.f32.mrb[9].mxu1  ;;  %v958_v60 = vpop.f32.mrb[10].mxu0  ;;  %v877_v37 = vunpack.c.h.bf16 %v1216_v10  ;;  %v909_v42 = vunpack.c.h.bf16 %v924_v15 }
  0xf8   : > { %719 = vst.msk [vmem:[%s1123_s8 + $0xa8] sm:$0xff] %vm697_vm1, %v686_v51  ;;  %v579_v63 = vmax.f32 %v483_v52, 0.0  ;;  %v539_v0 = vadd.f32 %v1110_v20, %v538_v59  ;;  %v486_v1 = vadd.f32 %v958_v60, %v1110_v20  ;;  %v974_v2 = vpop.f32.mrb[10].mxu1  ;;  %v477_v3 = vpop.f32.mrb[11].mxu0  ;;  %v873_v43 = vunpack.c.h.bf16 %v915_v16 }
  0xf9   : > { %v595_v5 = vmax.f32 %v547_v57, 0.0  ;;  %v577_v6 = vmax.f32 %v475_v58, 0.0  ;;  %v550_v7 = vadd.f32 %v974_v2, %v1110_v20  ;;  %v478_v8 = vadd.f32 %v1110_v20, %v477_v3  ;;  %v541_v9 = vpop.f32.mrb[11].mxu1 }
  0xfa   : > { %v675_v11 = vadd.f32 %v868_v45, %v579_v63  ;;  %v593_v12 = vmax.f32 %v539_v0, 0.0  ;;  %v580_v13 = vmax.f32 %v486_v1, 0.0  ;;  %v542_v14 = vadd.f32 %v1110_v20, %v541_v9 }
  0xfb   : > { %v691_v17 = vadd.f32 %v900_v49, %v595_v5  ;;  %v673_v18 = vadd.f32 %v864_v50, %v577_v6  ;;  %v596_v19 = vmax.f32 %v550_v7, 0.0  ;;  %v578_v21 = vmax.f32 %v478_v8, 0.0 }
  0xfc   : > { %708 = vst.msk [vmem:[%s1123_s8 + $0x50] sm:$0xff] %vm697_vm1, %v675_v11  ;;  %v689_v23 = vadd.f32 %v896_v55, %v593_v12  ;;  %v676_v24 = vadd.f32 %v869_v56, %v580_v13  ;;  %v594_v25 = vmax.f32 %v542_v14, 0.0  ;;  %v905_v49 = vunpack.c.h.bf16 %v923_v22 }
  0xfd   : > { %724 = vst.msk [vmem:[%s1123_s8 + $0xd0] sm:$0xff] %vm697_vm1, %v691_v17  ;;  %706 = vst.msk [vmem:[%s1123_s8 + $0x40] sm:$0xff] %vm697_vm1, %v673_v18  ;;  %v692_v27 = vadd.f32 %v901_v61, %v596_v19  ;;  %v674_v28 = vadd.f32 %v865_v62, %v578_v21  ;;  %v961_v29 = vpop.f32.mrb[12].mxu0 }
  0xfe   : > { %722 = vst.msk [vmem:[%s1123_s8 + $0xc0] sm:$0xff] %vm697_vm1, %v689_v23  ;;  %709 = vst.msk [vmem:[%s1123_s8 + $0x58] sm:$0xff] %vm697_vm1, %v676_v24  ;;  %v690_v32 = vadd.f32 %v897_v4, %v594_v25  ;;  %v499_v33 = vadd.f32 %v961_v29, %v1110_v20  ;;  %v977_v34 = vpop.f32.mrb[12].mxu1  ;;  %v490_v35 = vpop.f32.mrb[13].mxu0 }
  0xff   : > { %725 = vst.msk [vmem:[%s1123_s8 + $0xd8] sm:$0xff] %vm697_vm1, %v692_v27  ;;  %707 = vst.msk [vmem:[%s1123_s8 + $0x48] sm:$0xff] %vm697_vm1, %v674_v28  ;;  %v563_v38 = vadd.f32 %v977_v34, %v1110_v20  ;;  %v491_v39 = vadd.f32 %v1110_v20, %v490_v35  ;;  %v554_v40 = vpop.f32.mrb[13].mxu1  ;;  %v962_v41 = vpop.f32.mrb[14].mxu0 }
 0x100   : > { %723 = vst.msk [vmem:[%s1123_s8 + $0xc8] sm:$0xff] %vm697_vm1, %v690_v32  ;;  %v583_v44 = vmax.f32 %v499_v33, 0.0  ;;  %v555_v45 = vadd.f32 %v1110_v20, %v554_v40  ;;  %v502_v46 = vadd.f32 %v962_v41, %v1110_v20  ;;  %v978_v47 = vpop.f32.mrb[14].mxu1  ;;  %v493_v48 = vpop.f32.mrb[15].mxu0 }
 0x101   : > { %v599_v50 = vmax.f32 %v563_v38, 0.0  ;;  %v581_v51 = vmax.f32 %v491_v39, 0.0  ;;  %v566_v52 = vadd.f32 %v978_v47, %v1110_v20  ;;  %v494_v53 = vadd.f32 %v1110_v20, %v493_v48  ;;  %v557_v54 = vpop.f32.mrb[15].mxu1 }
 0x102   : > { %v679_v55 = vadd.f32 %v876_v26, %v583_v44  ;;  %v597_v56 = vmax.f32 %v555_v45, 0.0  ;;  %v584_v57 = vmax.f32 %v502_v46, 0.0  ;;  %v558_v58 = vadd.f32 %v1110_v20, %v557_v54 }
 0x103   : > { %v695_v59 = vadd.f32 %v908_v30, %v599_v50  ;;  %v677_v60 = vadd.f32 %v872_v31, %v581_v51  ;;  %v600_v61 = vmax.f32 %v566_v52, 0.0  ;;  %v582_v62 = vmax.f32 %v494_v53, 0.0 }
 0x104   : > { %712 = vst.msk [vmem:[%s1123_s8 + $0x70] sm:$0xff] %vm697_vm1, %v679_v55  ;;  %v693_v63 = vadd.f32 %v904_v36, %v597_v56  ;;  %v680_v0 = vadd.f32 %v877_v37, %v584_v57  ;;  %v598_v1 = vmax.f32 %v558_v58, 0.0 }
 0x105   : > { %728 = vst.msk [vmem:[%s1123_s8 + $0xf0] sm:$0xff] %vm697_vm1, %v695_v59  ;;  %710 = vst.msk [vmem:[%s1123_s8 + $0x60] sm:$0xff] %vm697_vm1, %v677_v60  ;;  %v696_v2 = vadd.f32 %v909_v42, %v600_v61  ;;  %v678_v3 = vadd.f32 %v873_v43, %v582_v62 }
 0x106   : > { %726 = vst.msk [vmem:[%s1123_s8 + $0xe0] sm:$0xff] %vm697_vm1, %v693_v63  ;;  %713 = vst.msk [vmem:[%s1123_s8 + $0x78] sm:$0xff] %vm697_vm1, %v680_v0  ;;  %v694_v20 = vadd.f32 %v905_v49, %v598_v1 }
 0x107   : > { %729 = vst.msk [vmem:[%s1123_s8 + $0xf8] sm:$0xff] %vm697_vm1, %v696_v2  ;;  %711 = vst.msk [vmem:[%s1123_s8 + $0x68] sm:$0xff] %vm697_vm1, %v678_v3 }
 0x108   : > { %727 = vst.msk [vmem:[%s1123_s8 + $0xe8] sm:$0xff] %vm697_vm1, %v694_v20 }
 0x109 PF: > { %s14_s15 = sadd.s32 1, %s1015_s15  }
 0x10a   : > { %p11_p4 = scmp.ge.s32.totalorder %s14_s15, 4  }
 0x10c   :  { %13 = sbr.rel (!%p11_p4) target bundleno = 1 (0x1), region = 69 }

</bundles_post_ra>
